<compile_context>
chip_gen: v7x
topology: tpu7x:2x2x1
jax: 0.10.0
libtpu: 0.0.40
codegen_flags: <defaults>
</compile_context>

<pallas_src>
import functools

import jax
import jax.numpy as jnp
import numpy as np
from jax.experimental import pallas as pl
from jax.experimental.pallas import tpu as pltpu

HP = 128   # lane-padded hidden width (all activations / weight tiles)
XD = 3     # spatial dimension


def _leaky(v, neg_slope):
    return jnp.where(v >= 0, v, neg_slope * v)


# ----------------------------- Pallas kernel ------------------------------- #

def _egnn_kernel(h0_ref, xf_ref, ea_ref, sr_ref, sc_ref, inv_ref,
                 embw_ref, embb_ref,
                 ew1h_ref, ew1c_ref, ew1s_ref, eb1_ref, ew2_ref, eb2_ref,
                 cw1_ref, cb1_ref, cw2_ref,
                 nw1h_ref, nw1a_ref, nb1_ref, nw2_ref, nb2_ref,
                 out_ref, *, hidden_nf, in_edge_nf, coords_weight, neg_slope):
    f32 = jnp.float32
    bf16 = jnp.bfloat16
    H = hidden_nf
    l = pl.program_id(1)                       # layer index (inner, "arbitrary")

    def mm(a, b):
        return jnp.dot(a, b, preferred_element_type=f32)

    # --- layer 0: node embedding, pack [h | x | 0] into the lane-dense state -
    @pl.when(l == 0)
    def _():
        emb = mm(h0_ref[0], embw_ref[...]) + embb_ref[...]    # [N, HP], zeros past H
        out_ref[0] = emb + xf_ref[0]                          # x lives in lanes H:H+3

    hx = out_ref[0]                                           # [N, HP] packed state
    Sr = sr_ref[...]                                          # [E, N] bf16 one_hot(row)
    Sc = sc_ref[...]                                          # [E, N] bf16 one_hot(col)
    inv_cnt = inv_ref[...]                                    # [N, 1]  1/clamp(deg, 1)

    # mask of the coordinate lanes (H .. H+XD-1)
    lane = jax.lax.broadcasted_iota(jnp.int32, (1, HP), 1)
    cmask = jnp.logical_and(lane >= H, lane < H + XD).astype(f32)

    # --- gathers: one bf16 MXU matmul per edge side (h and x fused) ----------
    hx_b = hx.astype(bf16)
    hxr = mm(Sr, hx_b)                                        # [E, HP] = [h[row]|x[row]|0]
    hxc = mm(Sc, hx_b)                                        # [E, HP] = [h[col]|x[col]|0]

    d = (hxr - hxc) * cmask                                   # coord_diff in coord lanes
    radial = jnp.sum(d * d, axis=-1, keepdims=True)           # [E, 1]

    # --- edge MLP:  Lin -> leaky -> Lin -> leaky ------------------------------
    ew1s = ew1s_ref[0]                                        # [1+Ein, HP] scalar rows
    pre = (mm(hxr, ew1h_ref[0]) + mm(hxc, ew1c_ref[0])
           + radial * ew1s[0:1, :] + eb1_ref[0])
    ea = ea_ref[0]                                            # [E, Ein]
    for j in range(in_edge_nf):                               # tiny-K terms on the VPU
        pre = pre + ea[:, j:j + 1] * ew1s[j + 1:j + 2, :]
    m = _leaky(pre, neg_slope)
    m = _leaky(mm(m, ew2_ref[0]) + eb2_ref[0], neg_slope)     # [E, HP], zeros past H

    # --- coord MLP:  Lin -> leaky -> Lin(H,1, no bias) ------------------------
    c = _leaky(mm(m, cw1_ref[0]) + cb1_ref[0], neg_slope)
    phi = jnp.sum(c * cw2_ref[0], axis=-1, keepdims=True)     # [E, 1]
    trans = jnp.clip(d * phi, -100.0, 100.0)                  # nonzero only in coord lanes

    # --- fused scatter-add: agg_h in lanes :H, sum(trans) in coord lanes ------
    scat = (m + trans).astype(bf16)                           # disjoint lanes
    agg = jax.lax.dot_general(Sr, scat,
                              dimension_numbers=(((0,), (0,)), ((), ())),
                              preferred_element_type=f32)     # [N, HP]

    # --- node MLP (residual) + coordinate update ------------------------------
    o = _leaky(mm(hx, nw1h_ref[0]) + mm(agg, nw1a_ref[0]) + nb1_ref[0], neg_slope)
    o = mm(o, nw2_ref[0]) + nb2_ref[0]                        # zeros outside lanes :H

    coord_add = agg * cmask * inv_cnt * coords_weight         # segment mean * weight
    out_ref[0] = hx + o + coord_add


# ------------------------------- wrapper ----------------------------------- #

@functools.partial(jax.jit,
                   static_argnames=("hidden_nf", "n_layers",
                                    "coords_weight", "neg_slope"))
def egnn_pallas(h, x, row, col, edge_attr, params, *, hidden_nf, n_layers,
                coords_weight=1.0, neg_slope=0.2):
    """Batched EGNN forward.  h:[B,N,Fin], x:[B,N,3], edge_attr:[B,E,Ein];
    row/col: shared int32 edge index of length E (same topology per graph)."""
    B, N, Fin = h.shape
    E = row.shape[0]
    Ein = edge_attr.shape[-1]
    H, L = hidden_nf, n_layers
    assert H + XD <= HP
    f32 = jnp.float32

    def pad2(w, r, c):
        w = jnp.asarray(w, f32)
        return jnp.zeros((r, c), f32).at[:w.shape[0], :w.shape[1]].set(w)

    # glue: bf16 incidence matrices, inverse degree, packed/padded inputs
    sr = jax.nn.one_hot(row, N, dtype=jnp.bfloat16)           # [E, N]
    sc = jax.nn.one_hot(col, N, dtype=jnp.bfloat16)           # [E, N]
    deg = jnp.zeros((N,), f32).at[row].add(1.0)
    inv_cnt = (1.0 / jnp.maximum(deg, 1.0)).reshape(N, 1)
    xf = jnp.zeros((B, N, HP), f32).at[:, :, H:H + XD].set(x.astype(f32))

    emb_w = pad2(params["emb_w"], Fin, HP)
    emb_b = pad2(params["emb_b"], 1, HP)

    ew1h, ew1c, ew1s, eb1, ew2, eb2 = [], [], [], [], [], []
    cw1, cb1, cw2 = [], [], []
    nw1h, nw1a, nb1, nw2, nb2 = [], [], [], [], []
    for li in range(L):
        w1 = jnp.asarray(params["ew1"][li], f32)              # [2H+1+Ein, H]
        ew1h.append(pad2(w1[:H], HP, HP))
        ew1c.append(pad2(w1[H:2 * H], HP, HP))
        ew1s.append(pad2(w1[2 * H:], 1 + Ein, HP))            # radial + edge_attr rows
        eb1.append(pad2(params["eb1"][li], 1, HP))
        ew2.append(pad2(params["ew2"][li], HP, HP))
        eb2.append(pad2(params["eb2"][li], 1, HP))
        cw1.append(pad2(params["cw1"][li], HP, HP))
        cb1.append(pad2(params["cb1"][li], 1, HP))
        cw2.append(pad2(jnp.asarray(params["cw2"][li], f32).T, 1, HP))
        n1 = jnp.asarray(params["nw1"][li], f32)              # [2H, H]
        nw1h.append(pad2(n1[:H], HP, HP))
        nw1a.append(pad2(n1[H:], HP, HP))
        nb1.append(pad2(params["nb1"][li], 1, HP))
        nw2.append(pad2(params["nw2"][li], HP, HP))
        nb2.append(pad2(params["nb2"][li], 1, HP))

    stk = lambda xs: jnp.stack(xs, axis=0)
    args = (h.astype(f32), xf, edge_attr.astype(f32), sr, sc, inv_cnt,
            emb_w, emb_b,
            stk(ew1h), stk(ew1c), stk(ew1s), stk(eb1), stk(ew2), stk(eb2),
            stk(cw1), stk(cb1), stk(cw2),
            stk(nw1h), stk(nw1a), stk(nb1), stk(nw2), stk(nb2))

    def graph_spec(a):   # per-graph block, resident across the layer axis
        return pl.BlockSpec((1,) + a.shape[1:], lambda b, l: (b, 0, 0))

    def const_spec(a):   # shared across the whole grid
        return pl.BlockSpec(a.shape, lambda b, l: (0, 0))

    def layer_spec(a):   # per-layer weight slab, streamed along the inner axis
        return pl.BlockSpec((1,) + a.shape[1:], lambda b, l: (l, 0, 0))

    in_specs = ([graph_spec(args[0]), graph_spec(args[1]), graph_spec(args[2])]
                + [const_spec(a) for a in args[3:8]]
                + [layer_spec(a) for a in args[8:]])
    out_spec = pl.BlockSpec((1, N, HP), lambda b, l: (b, 0, 0))

    # advisory cost estimate (f32-equivalent matmul flops)
    flops_layer = (2 * 2 * E * N * HP            # gathers
                   + 2 * E * N * HP              # fused scatter
                   + 4 * 2 * E * HP * HP         # edge + coord MLP matmuls
                   + 3 * 2 * N * HP * HP)        # node MLP matmuls
    flops = B * (2 * N * Fin * HP + L * flops_layer)
    bytes_accessed = (sum(int(a.size) * a.dtype.itemsize for a in args)
                      + B * N * HP * 4)

    kernel = functools.partial(_egnn_kernel, hidden_nf=H, in_edge_nf=Ein,
                               coords_weight=coords_weight, neg_slope=neg_slope)

    out = pl.pallas_call(
        kernel,
        grid=(B, L),
        in_specs=in_specs,
        out_specs=out_spec,
        out_shape=jax.ShapeDtypeStruct((B, N, HP), f32),
        compiler_params=pltpu.CompilerParams(
            dimension_semantics=("parallel", "arbitrary"),
            vmem_limit_bytes=32 * 1024 * 1024),
        cost_estimate=pl.CostEstimate(flops=flops, transcendentals=0,
                                      bytes_accessed=bytes_accessed),
    )(*args)

    return out[:, :, H:H + XD]                  # lane-dense out; slice x here


# ------------------------ deterministic parameter init --------------------- #

def init_params(key, in_node_nf, in_edge_nf, hidden_nf, n_layers):
    H = hidden_nf

    def linear(k, fan_in, fan_out):
        kw, kb = jax.random.split(k)
        bound = 1.0 / np.sqrt(fan_in)
        w = jax.random.uniform(kw, (fan_in, fan_out), jnp.float32, -bound, bound)
        b = jax.random.uniform(kb, (1, fan_out), jnp.float32, -bound, bound)
        return w, b

    keys = jax.random.split(key, 1 + n_layers)
    emb_w, emb_b = linear(keys[0], in_node_nf, H)

    ew1s, eb1s, ew2s, eb2s = [], [], [], []
    cw1s, cb1s, cw2s = [], [], []
    nw1s, nb1s, nw2s, nb2s = [], [], [], []
    for li in range(n_layers):
        lk = jax.random.split(keys[1 + li], 6)
        w, b = linear(lk[0], 2 * H + 1 + in_edge_nf, H); ew1s.append(w); eb1s.append(b)
        w, b = linear(lk[1], H, H);                      ew2s.append(w); eb2s.append(b)
        w, b = linear(lk[2], H, H);                      cw1s.append(w); cb1s.append(b)
        xb = 0.001 * np.sqrt(6.0 / (H + 1))              # xavier_uniform(gain=0.001)
        cw2s.append(jax.random.uniform(lk[3], (H, 1), jnp.float32, -xb, xb))
        w, b = linear(lk[4], 2 * H, H);                  nw1s.append(w); nb1s.append(b)
        w, b = linear(lk[5], H, H);                      nw2s.append(w); nb2s.append(b)

    stack = lambda xs: jnp.stack(xs, axis=0)
    return dict(
        emb_w=emb_w, emb_b=emb_b,
        ew1=stack(ew1s), eb1=stack(eb1s), ew2=stack(ew2s), eb2=stack(eb2s),
        cw1=stack(cw1s), cb1=stack(cb1s), cw2=stack(cw2s),
        nw1=stack(nw1s), nb1=stack(nb1s), nw2=stack(nw2s), nb2=stack(nb2s),
    )


# ------------------------------ pure-JAX reference ------------------------- #

def egnn_reference(h, x, row, col, edge_attr, params, *, hidden_nf, n_layers,
                   coords_weight=1.0, neg_slope=0.2):
    H = hidden_nf
    leaky = lambda v: jnp.where(v >= 0, v, neg_slope * v)
    n_nodes = h.shape[0]

    h = h @ params["emb_w"] + params["emb_b"]
    for li in range(n_layers):
        ew1, eb1 = params["ew1"][li], params["eb1"][li]
        ew2, eb2 = params["ew2"][li], params["eb2"][li]
        cw1, cb1, cw2 = params["cw1"][li], params["cb1"][li], params["cw2"][li]
        nw1, nb1 = params["nw1"][li], params["nb1"][li]
        nw2, nb2 = params["nw2"][li], params["nb2"][li]

        coord_diff = x[row] - x[col]
        radial = jnp.sum(coord_diff ** 2, axis=1, keepdims=True)

        edge_in = jnp.concatenate([h[row], h[col], radial, edge_attr], axis=1)
        m = leaky(edge_in @ ew1 + eb1)
        m = leaky(m @ ew2 + eb2)

        phi = leaky(m @ cw1 + cb1) @ cw2
        trans = jnp.clip(coord_diff * phi, -100.0, 100.0)
        summ = jnp.zeros((n_nodes, 3), jnp.float32).at[row].add(trans)
        cnt = jnp.zeros((n_nodes, 1), jnp.float32).at[row].add(1.0)
        x = x + (summ / jnp.maximum(cnt, 1.0)) * coords_weight

        agg = jnp.zeros((n_nodes, H), jnp.float32).at[row].add(m)
        o = leaky(jnp.concatenate([h, agg], axis=1) @ nw1 + nb1)
        h = h + (o @ nw2 + nb2)
    return x


# ----------------------------------- main ----------------------------------- #

if __name__ == "__main__":
    in_node_nf, in_edge_nf, hidden_nf, n_layers = 4, 2, 32, 4
    B, n_nodes = 2, 8

    key = jax.random.PRNGKey(0)
    k_h, k_x, k_ea, k_p = jax.random.split(key, 4)

    # fully-connected graph without self loops (n-body convention, shared topology)
    rows, cols = [], []
    for i in range(n_nodes):
        for j in range(n_nodes):
            if i != j:
                rows.append(i)
                cols.append(j)
    row = jnp.asarray(rows, dtype=jnp.int32)
    col = jnp.asarray(cols, dtype=jnp.int32)
    n_edges = row.shape[0]  # 56

    h = jax.random.normal(k_h, (B, n_nodes, in_node_nf), jnp.float32)
    x = jax.random.normal(k_x, (B, n_nodes, 3), jnp.float32)
    edge_attr = jax.random.normal(k_ea, (B, n_edges, in_edge_nf), jnp.float32)

    params = init_params(k_p, in_node_nf, in_edge_nf, hidden_nf, n_layers)

    out = egnn_pallas(h, x, row, col, edge_attr, params,
                      hidden_nf=hidden_nf, n_layers=n_layers)
    out = jax.block_until_ready(out)

    ref = jnp.stack([
        egnn_reference(h[b], x[b], row, col, edge_attr[b], params,
                       hidden_nf=hidden_nf, n_layers=n_layers)
        for b in range(B)])
    ref = jax.block_until_ready(ref)

    max_diff = float(jnp.max(jnp.abs(out - ref)))
    assert out.shape == (B, n_nodes, 3) and out.dtype == jnp.float32
    assert max_diff < 1e-2, f"mismatch vs reference: {max_diff}"
    print("KERNEL_OK")
</pallas_src>

<mosaic_0001>
module attributes {stable_mosaic.version = 11 : i64} {
  func.func @_egnn_kernel(%arg0: i32, %arg1: i32, %arg2: memref<1x8x4xf32, #tpu.memory_space<vmem>>, %arg3: memref<1x8x128xf32, #tpu.memory_space<vmem>>, %arg4: memref<1x56x2xf32, #tpu.memory_space<vmem>>, %arg5: memref<56x8xbf16, #tpu.memory_space<vmem>>, %arg6: memref<56x8xbf16, #tpu.memory_space<vmem>>, %arg7: memref<8x1xf32, #tpu.memory_space<vmem>>, %arg8: memref<4x128xf32, #tpu.memory_space<vmem>>, %arg9: memref<1x128xf32, #tpu.memory_space<vmem>>, %arg10: memref<1x128x128xf32, #tpu.memory_space<vmem>>, %arg11: memref<1x128x128xf32, #tpu.memory_space<vmem>>, %arg12: memref<1x3x128xf32, #tpu.memory_space<vmem>>, %arg13: memref<1x1x128xf32, #tpu.memory_space<vmem>>, %arg14: memref<1x128x128xf32, #tpu.memory_space<vmem>>, %arg15: memref<1x1x128xf32, #tpu.memory_space<vmem>>, %arg16: memref<1x128x128xf32, #tpu.memory_space<vmem>>, %arg17: memref<1x1x128xf32, #tpu.memory_space<vmem>>, %arg18: memref<1x1x128xf32, #tpu.memory_space<vmem>>, %arg19: memref<1x128x128xf32, #tpu.memory_space<vmem>>, %arg20: memref<1x128x128xf32, #tpu.memory_space<vmem>>, %arg21: memref<1x1x128xf32, #tpu.memory_space<vmem>>, %arg22: memref<1x128x128xf32, #tpu.memory_space<vmem>>, %arg23: memref<1x1x128xf32, #tpu.memory_space<vmem>>, %arg24: memref<1x8x128xf32, #tpu.memory_space<vmem>>) attributes {dimension_semantics = [#tpu.dimension_semantics<parallel>, #tpu.dimension_semantics<arbitrary>], iteration_bounds = array<i64: 2, 4>, scalar_prefetch = 0 : i64, scratch_operands = 0 : i64, tpu.core_type = #tpu.core_type<tc>, window_params = [{transform_indices = @transform_0, window_bounds = array<i64: 1, 8, 4>}, {transform_indices = @transform_1, window_bounds = array<i64: 1, 8, 128>}, {transform_indices = @transform_2, window_bounds = array<i64: 1, 56, 2>}, {pipeline_mode = #tpu.pipeline_mode<synchronous>, transform_indices = @transform_3, window_bounds = array<i64: 56, 8>}, {pipeline_mode = #tpu.pipeline_mode<synchronous>, transform_indices = @transform_4, window_bounds = array<i64: 56, 8>}, {pipeline_mode = #tpu.pipeline_mode<synchronous>, transform_indices = @transform_5, window_bounds = array<i64: 8, 1>}, {pipeline_mode = #tpu.pipeline_mode<synchronous>, transform_indices = @transform_6, window_bounds = array<i64: 4, 128>}, {pipeline_mode = #tpu.pipeline_mode<synchronous>, transform_indices = @transform_7, window_bounds = array<i64: 1, 128>}, {transform_indices = @transform_8, window_bounds = array<i64: 1, 128, 128>}, {transform_indices = @transform_9, window_bounds = array<i64: 1, 128, 128>}, {transform_indices = @transform_10, window_bounds = array<i64: 1, 3, 128>}, {transform_indices = @transform_11, window_bounds = array<i64: 1, 1, 128>}, {transform_indices = @transform_12, window_bounds = array<i64: 1, 128, 128>}, {transform_indices = @transform_13, window_bounds = array<i64: 1, 1, 128>}, {transform_indices = @transform_14, window_bounds = array<i64: 1, 128, 128>}, {transform_indices = @transform_15, window_bounds = array<i64: 1, 1, 128>}, {transform_indices = @transform_16, window_bounds = array<i64: 1, 1, 128>}, {transform_indices = @transform_17, window_bounds = array<i64: 1, 128, 128>}, {transform_indices = @transform_18, window_bounds = array<i64: 1, 128, 128>}, {transform_indices = @transform_19, window_bounds = array<i64: 1, 1, 128>}, {transform_indices = @transform_20, window_bounds = array<i64: 1, 128, 128>}, {transform_indices = @transform_21, window_bounds = array<i64: 1, 1, 128>}, {transform_indices = @transform_22, window_bounds = array<i64: 1, 8, 128>}]} {
    %c0_i32 = arith.constant 0 : i32
    %0 = arith.cmpi eq, %arg1, %c0_i32 : i32
    %1 = arith.extui %0 : i1 to i32
    %c0_i32_0 = arith.constant 0 : i32
    %2 = arith.cmpi ne, %1, %c0_i32_0 : i32
    scf.if %2 {
      %c0_79 = arith.constant 0 : index
      %c0_80 = arith.constant 0 : index
      %c0_81 = arith.constant 0 : index
      %135 = vector.load %arg2[%c0_79, %c0_80, %c0_81] : memref<1x8x4xf32, #tpu.memory_space<vmem>>, vector<1x8x4xf32>
      %136 = vector.shape_cast %135 : vector<1x8x4xf32> to vector<8x4xf32>
      %c0_82 = arith.constant 0 : index
      %c0_83 = arith.constant 0 : index
      %137 = vector.load %arg8[%c0_82, %c0_83] : memref<4x128xf32, #tpu.memory_space<vmem>>, vector<4x128xf32>
      %cst_84 = arith.constant dense<0.000000e+00> : vector<8x128xf32>
      %138 = tpu.matmul %136, %137, %cst_84 {dimension_numbers = #tpu.dot_dimension_numbers<[1], [0], [0], [1], [0, 0, 1, 1], [], []>} : vector<8x4xf32>, vector<4x128xf32>, vector<8x128xf32> -> vector<8x128xf32>
      %c0_85 = arith.constant 0 : index
      %c0_86 = arith.constant 0 : index
      %139 = vector.load %arg9[%c0_85, %c0_86] : memref<1x128xf32, #tpu.memory_space<vmem>>, vector<1x128xf32>
      %140 = vector.broadcast %139 : vector<1x128xf32> to vector<8x128xf32>
      %141 = arith.addf %138, %140 : vector<8x128xf32>
      %c0_87 = arith.constant 0 : index
      %c0_88 = arith.constant 0 : index
      %c0_89 = arith.constant 0 : index
      %142 = vector.load %arg3[%c0_87, %c0_88, %c0_89] : memref<1x8x128xf32, #tpu.memory_space<vmem>>, vector<1x8x128xf32>
      %143 = vector.shape_cast %142 : vector<1x8x128xf32> to vector<8x128xf32>
      %144 = arith.addf %141, %143 : vector<8x128xf32>
      %c0_90 = arith.constant 0 : index
      %c0_91 = arith.constant 0 : index
      %c0_92 = arith.constant 0 : index
      %145 = vector.load %arg24[%c0_90, %c0_91, %c0_92] : memref<1x8x128xf32, #tpu.memory_space<vmem>>, vector<1x8x128xf32>
      %146 = vector.shape_cast %145 : vector<1x8x128xf32> to vector<8x128xf32>
      %147 = vector.shape_cast %144 : vector<8x128xf32> to vector<1x8x128xf32>
      tpu.vector_store %arg24[%c0_90, %c0_91, %c0_92], %147 {strides = array<i32>} : memref<1x8x128xf32, #tpu.memory_space<vmem>>, vector<1x8x128xf32>,
    } else {
    }
    %c0 = arith.constant 0 : index
    %c0_1 = arith.constant 0 : index
    %c0_2 = arith.constant 0 : index
    %3 = vector.load %arg24[%c0, %c0_1, %c0_2] : memref<1x8x128xf32, #tpu.memory_space<vmem>>, vector<1x8x128xf32>
    %4 = vector.shape_cast %3 : vector<1x8x128xf32> to vector<8x128xf32>
    %c0_3 = arith.constant 0 : index
    %c0_4 = arith.constant 0 : index
    %5 = vector.load %arg5[%c0_3, %c0_4] : memref<56x8xbf16, #tpu.memory_space<vmem>>, vector<56x8xbf16>
    %c0_5 = arith.constant 0 : index
    %c0_6 = arith.constant 0 : index
    %6 = vector.load %arg6[%c0_5, %c0_6] : memref<56x8xbf16, #tpu.memory_space<vmem>>, vector<56x8xbf16>
    %c0_7 = arith.constant 0 : index
    %c0_8 = arith.constant 0 : index
    %7 = vector.load %arg7[%c0_7, %c0_8] : memref<8x1xf32, #tpu.memory_space<vmem>>, vector<8x1xf32>
    %8 = tpu.iota {dimensions = array<i32: 1>} : vector<1x128xi32>
    %c32_i32 = arith.constant 32 : i32
    %9 = vector.broadcast %c32_i32 : i32 to vector<1x128xi32>
    %10 = arith.cmpi sge, %8, %9 : vector<1x128xi32>
    %c35_i32 = arith.constant 35 : i32
    %11 = vector.broadcast %c35_i32 : i32 to vector<1x128xi32>
    %12 = arith.cmpi slt, %8, %11 : vector<1x128xi32>
    %13 = arith.andi %10, %12 : vector<1x128xi1>
    %14 = arith.extui %13 : vector<1x128xi1> to vector<1x128xi32>
    %15 = arith.sitofp %14 : vector<1x128xi32> to vector<1x128xf32>
    %16 = arith.truncf %4 : vector<8x128xf32> to vector<8x128xbf16>
    %cst = arith.constant dense<0.000000e+00> : vector<56x128xf32>
    %17 = tpu.matmul %5, %16, %cst {dimension_numbers = #tpu.dot_dimension_numbers<[1], [0], [0], [1], [0, 0, 1, 1], [], []>} : vector<56x8xbf16>, vector<8x128xbf16>, vector<56x128xf32> -> vector<56x128xf32>
    %cst_9 = arith.constant dense<0.000000e+00> : vector<56x128xf32>
    %18 = tpu.matmul %6, %16, %cst_9 {dimension_numbers = #tpu.dot_dimension_numbers<[1], [0], [0], [1], [0, 0, 1, 1], [], []>} : vector<56x8xbf16>, vector<8x128xbf16>, vector<56x128xf32> -> vector<56x128xf32>
    %19 = arith.subf %17, %18 : vector<56x128xf32>
    %20 = vector.broadcast %15 : vector<1x128xf32> to vector<56x128xf32>
    %21 = arith.mulf %19, %20 : vector<56x128xf32>
    %22 = arith.mulf %21, %21 : vector<56x128xf32>
    %cst_10 = arith.constant dense<0.000000e+00> : vector<56xf32>
    %23 = vector.multi_reduction <add>, %22, %cst_10 [1] : vector<56x128xf32> to vector<56xf32>
    %24 = vector.shape_cast %23 : vector<56xf32> to vector<56x1xf32>
    %c0_11 = arith.constant 0 : index
    %c0_12 = arith.constant 0 : index
    %c0_13 = arith.constant 0 : index
    %25 = vector.load %arg12[%c0_11, %c0_12, %c0_13] : memref<1x3x128xf32, #tpu.memory_space<vmem>>, vector<1x3x128xf32>
    %26 = vector.shape_cast %25 : vector<1x3x128xf32> to vector<3x128xf32>
    %c0_14 = arith.constant 0 : index
    %c0_15 = arith.constant 0 : index
    %c0_16 = arith.constant 0 : index
    %27 = vector.load %arg10[%c0_14, %c0_15, %c0_16] : memref<1x128x128xf32, #tpu.memory_space<vmem>>, vector<1x128x128xf32>
    %28 = vector.shape_cast %27 : vector<1x128x128xf32> to vector<128x128xf32>
    %cst_17 = arith.constant dense<0.000000e+00> : vector<56x128xf32>
    %29 = tpu.matmul %17, %28, %cst_17 {dimension_numbers = #tpu.dot_dimension_numbers<[1], [0], [0], [1], [0, 0, 1, 1], [], []>} : vector<56x128xf32>, vector<128x128xf32>, vector<56x128xf32> -> vector<56x128xf32>
    %c0_18 = arith.constant 0 : index
    %c0_19 = arith.constant 0 : index
    %c0_20 = arith.constant 0 : index
    %30 = vector.load %arg11[%c0_18, %c0_19, %c0_20] : memref<1x128x128xf32, #tpu.memory_space<vmem>>, vector<1x128x128xf32>
    %31 = vector.shape_cast %30 : vector<1x128x128xf32> to vector<128x128xf32>
    %cst_21 = arith.constant dense<0.000000e+00> : vector<56x128xf32>
    %32 = tpu.matmul %18, %31, %cst_21 {dimension_numbers = #tpu.dot_dimension_numbers<[1], [0], [0], [1], [0, 0, 1, 1], [], []>} : vector<56x128xf32>, vector<128x128xf32>, vector<56x128xf32> -> vector<56x128xf32>
    %33 = arith.addf %29, %32 : vector<56x128xf32>
    %34 = vector.extract_strided_slice %26 {offsets = [0, 0], sizes = [1, 128], strides = [1, 1]} : vector<3x128xf32> to vector<1x128xf32>
    %35 = vector.broadcast %24 : vector<56x1xf32> to vector<56x128xf32>
    %36 = vector.broadcast %34 : vector<1x128xf32> to vector<56x128xf32>
    %37 = arith.mulf %35, %36 : vector<56x128xf32>
    %38 = arith.addf %33, %37 : vector<56x128xf32>
    %c0_22 = arith.constant 0 : index
    %c0_23 = arith.constant 0 : index
    %c0_24 = arith.constant 0 : index
    %39 = vector.load %arg13[%c0_22, %c0_23, %c0_24] : memref<1x1x128xf32, #tpu.memory_space<vmem>>, vector<1x1x128xf32>
    %40 = vector.shape_cast %39 : vector<1x1x128xf32> to vector<1x128xf32>
    %41 = vector.broadcast %40 : vector<1x128xf32> to vector<56x128xf32>
    %42 = arith.addf %38, %41 : vector<56x128xf32>
    %c0_25 = arith.constant 0 : index
    %c0_26 = arith.constant 0 : index
    %c0_27 = arith.constant 0 : index
    %43 = vector.load %arg4[%c0_25, %c0_26, %c0_27] : memref<1x56x2xf32, #tpu.memory_space<vmem>>, vector<1x56x2xf32>
    %44 = vector.shape_cast %43 : vector<1x56x2xf32> to vector<56x2xf32>
    %45 = vector.extract_strided_slice %44 {offsets = [0, 0], sizes = [56, 1], strides = [1, 1]} : vector<56x2xf32> to vector<56x1xf32>
    %46 = vector.extract_strided_slice %26 {offsets = [1, 0], sizes = [1, 128], strides = [1, 1]} : vector<3x128xf32> to vector<1x128xf32>
    %47 = vector.broadcast %45 : vector<56x1xf32> to vector<56x128xf32>
    %48 = vector.broadcast %46 : vector<1x128xf32> to vector<56x128xf32>
    %49 = arith.mulf %47, %48 : vector<56x128xf32>
    %50 = arith.addf %42, %49 : vector<56x128xf32>
    %51 = vector.extract_strided_slice %44 {offsets = [0, 1], sizes = [56, 1], strides = [1, 1]} : vector<56x2xf32> to vector<56x1xf32>
    %52 = vector.extract_strided_slice %26 {offsets = [2, 0], sizes = [1, 128], strides = [1, 1]} : vector<3x128xf32> to vector<1x128xf32>
    %53 = vector.broadcast %51 : vector<56x1xf32> to vector<56x128xf32>
    %54 = vector.broadcast %52 : vector<1x128xf32> to vector<56x128xf32>
    %55 = arith.mulf %53, %54 : vector<56x128xf32>
    %56 = arith.addf %50, %55 : vector<56x128xf32>
    %cst_28 = arith.constant 0.000000e+00 : f32
    %57 = vector.broadcast %cst_28 : f32 to vector<56x128xf32>
    %58 = arith.cmpf oge, %56, %57 : vector<56x128xf32>
    %cst_29 = arith.constant 2.000000e-01 : f32
    %59 = vector.broadcast %cst_29 : f32 to vector<56x128xf32>
    %60 = arith.mulf %59, %56 : vector<56x128xf32>
    %61 = arith.select %58, %56, %60 : vector<56x128xi1>, vector<56x128xf32>
    %c0_30 = arith.constant 0 : index
    %c0_31 = arith.constant 0 : index
    %c0_32 = arith.constant 0 : index
    %62 = vector.load %arg14[%c0_30, %c0_31, %c0_32] : memref<1x128x128xf32, #tpu.memory_space<vmem>>, vector<1x128x128xf32>
    %63 = vector.shape_cast %62 : vector<1x128x128xf32> to vector<128x128xf32>
    %cst_33 = arith.constant dense<0.000000e+00> : vector<56x128xf32>
    %64 = tpu.matmul %61, %63, %cst_33 {dimension_numbers = #tpu.dot_dimension_numbers<[1], [0], [0], [1], [0, 0, 1, 1], [], []>} : vector<56x128xf32>, vector<128x128xf32>, vector<56x128xf32> -> vector<56x128xf32>
    %c0_34 = arith.constant 0 : index
    %c0_35 = arith.constant 0 : index
    %c0_36 = arith.constant 0 : index
    %65 = vector.load %arg15[%c0_34, %c0_35, %c0_36] : memref<1x1x128xf32, #tpu.memory_space<vmem>>, vector<1x1x128xf32>
    %66 = vector.shape_cast %65 : vector<1x1x128xf32> to vector<1x128xf32>
    %67 = vector.broadcast %66 : vector<1x128xf32> to vector<56x128xf32>
    %68 = arith.addf %64, %67 : vector<56x128xf32>
    %cst_37 = arith.constant 0.000000e+00 : f32
    %69 = vector.broadcast %cst_37 : f32 to vector<56x128xf32>
    %70 = arith.cmpf oge, %68, %69 : vector<56x128xf32>
    %cst_38 = arith.constant 2.000000e-01 : f32
    %71 = vector.broadcast %cst_38 : f32 to vector<56x128xf32>
    %72 = arith.mulf %71, %68 : vector<56x128xf32>
    %73 = arith.select %70, %68, %72 : vector<56x128xi1>, vector<56x128xf32>
    %c0_39 = arith.constant 0 : index
    %c0_40 = arith.constant 0 : index
    %c0_41 = arith.constant 0 : index
    %74 = vector.load %arg16[%c0_39, %c0_40, %c0_41] : memref<1x128x128xf32, #tpu.memory_space<vmem>>, vector<1x128x128xf32>
    %75 = vector.shape_cast %74 : vector<1x128x128xf32> to vector<128x128xf32>
    %cst_42 = arith.constant dense<0.000000e+00> : vector<56x128xf32>
    %76 = tpu.matmul %73, %75, %cst_42 {dimension_numbers = #tpu.dot_dimension_numbers<[1], [0], [0], [1], [0, 0, 1, 1], [], []>} : vector<56x128xf32>, vector<128x128xf32>, vector<56x128xf32> -> vector<56x128xf32>
    %c0_43 = arith.constant 0 : index
    %c0_44 = arith.constant 0 : index
    %c0_45 = arith.constant 0 : index
    %77 = vector.load %arg17[%c0_43, %c0_44, %c0_45] : memref<1x1x128xf32, #tpu.memory_space<vmem>>, vector<1x1x128xf32>
    %78 = vector.shape_cast %77 : vector<1x1x128xf32> to vector<1x128xf32>
    %79 = vector.broadcast %78 : vector<1x128xf32> to vector<56x128xf32>
    %80 = arith.addf %76, %79 : vector<56x128xf32>
    %cst_46 = arith.constant 0.000000e+00 : f32
    %81 = vector.broadcast %cst_46 : f32 to vector<56x128xf32>
    %82 = arith.cmpf oge, %80, %81 : vector<56x128xf32>
    %cst_47 = arith.constant 2.000000e-01 : f32
    %83 = vector.broadcast %cst_47 : f32 to vector<56x128xf32>
    %84 = arith.mulf %83, %80 : vector<56x128xf32>
    %85 = arith.select %82, %80, %84 : vector<56x128xi1>, vector<56x128xf32>
    %c0_48 = arith.constant 0 : index
    %c0_49 = arith.constant 0 : index
    %c0_50 = arith.constant 0 : index
    %86 = vector.load %arg18[%c0_48, %c0_49, %c0_50] : memref<1x1x128xf32, #tpu.memory_space<vmem>>, vector<1x1x128xf32>
    %87 = vector.shape_cast %86 : vector<1x1x128xf32> to vector<1x128xf32>
    %88 = vector.broadcast %87 : vector<1x128xf32> to vector<56x128xf32>
    %89 = arith.mulf %85, %88 : vector<56x128xf32>
    %cst_51 = arith.constant dense<0.000000e+00> : vector<56xf32>
    %90 = vector.multi_reduction <add>, %89, %cst_51 [1] : vector<56x128xf32> to vector<56xf32>
    %91 = vector.shape_cast %90 : vector<56xf32> to vector<56x1xf32>
    %92 = vector.broadcast %91 : vector<56x1xf32> to vector<56x128xf32>
    %93 = arith.mulf %21, %92 : vector<56x128xf32>
    %cst_52 = arith.constant -1.000000e+02 : f32
    %cst_53 = arith.constant 1.000000e+02 : f32
    %94 = vector.broadcast %cst_52 : f32 to vector<56x128xf32>
    %95 = arith.maximumf %94, %93 : vector<56x128xf32>
    %96 = vector.broadcast %cst_53 : f32 to vector<56x128xf32>
    %97 = arith.minimumf %96, %95 : vector<56x128xf32>
    %98 = arith.addf %73, %97 : vector<56x128xf32>
    %99 = arith.truncf %98 : vector<56x128xf32> to vector<56x128xbf16>
    %cst_54 = arith.constant dense<0.000000e+00> : vector<8x128xf32>
    %100 = tpu.matmul %5, %99, %cst_54 {dimension_numbers = #tpu.dot_dimension_numbers<[0], [0], [1], [1], [0, 1, 1, 1], [], []>} : vector<56x8xbf16>, vector<56x128xbf16>, vector<8x128xf32> -> vector<8x128xf32>
    %c0_55 = arith.constant 0 : index
    %c0_56 = arith.constant 0 : index
    %c0_57 = arith.constant 0 : index
    %101 = vector.load %arg19[%c0_55, %c0_56, %c0_57] : memref<1x128x128xf32, #tpu.memory_space<vmem>>, vector<1x128x128xf32>
    %102 = vector.shape_cast %101 : vector<1x128x128xf32> to vector<128x128xf32>
    %cst_58 = arith.constant dense<0.000000e+00> : vector<8x128xf32>
    %103 = tpu.matmul %4, %102, %cst_58 {dimension_numbers = #tpu.dot_dimension_numbers<[1], [0], [0], [1], [0, 0, 1, 1], [], []>} : vector<8x128xf32>, vector<128x128xf32>, vector<8x128xf32> -> vector<8x128xf32>
    %c0_59 = arith.constant 0 : index
    %c0_60 = arith.constant 0 : index
    %c0_61 = arith.constant 0 : index
    %104 = vector.load %arg20[%c0_59, %c0_60, %c0_61] : memref<1x128x128xf32, #tpu.memory_space<vmem>>, vector<1x128x128xf32>
    %105 = vector.shape_cast %104 : vector<1x128x128xf32> to vector<128x128xf32>
    %cst_62 = arith.constant dense<0.000000e+00> : vector<8x128xf32>
    %106 = tpu.matmul %100, %105, %cst_62 {dimension_numbers = #tpu.dot_dimension_numbers<[1], [0], [0], [1], [0, 0, 1, 1], [], []>} : vector<8x128xf32>, vector<128x128xf32>, vector<8x128xf32> -> vector<8x128xf32>
    %107 = arith.addf %103, %106 : vector<8x128xf32>
    %c0_63 = arith.constant 0 : index
    %c0_64 = arith.constant 0 : index
    %c0_65 = arith.constant 0 : index
    %108 = vector.load %arg21[%c0_63, %c0_64, %c0_65] : memref<1x1x128xf32, #tpu.memory_space<vmem>>, vector<1x1x128xf32>
    %109 = vector.shape_cast %108 : vector<1x1x128xf32> to vector<1x128xf32>
    %110 = vector.broadcast %109 : vector<1x128xf32> to vector<8x128xf32>
    %111 = arith.addf %107, %110 : vector<8x128xf32>
    %cst_66 = arith.constant 0.000000e+00 : f32
    %112 = vector.broadcast %cst_66 : f32 to vector<8x128xf32>
    %113 = arith.cmpf oge, %111, %112 : vector<8x128xf32>
    %cst_67 = arith.constant 2.000000e-01 : f32
    %114 = vector.broadcast %cst_67 : f32 to vector<8x128xf32>
    %115 = arith.mulf %114, %111 : vector<8x128xf32>
    %116 = arith.select %113, %111, %115 : vector<8x128xi1>, vector<8x128xf32>
    %c0_68 = arith.constant 0 : index
    %c0_69 = arith.constant 0 : index
    %c0_70 = arith.constant 0 : index
    %117 = vector.load %arg22[%c0_68, %c0_69, %c0_70] : memref<1x128x128xf32, #tpu.memory_space<vmem>>, vector<1x128x128xf32>
    %118 = vector.shape_cast %117 : vector<1x128x128xf32> to vector<128x128xf32>
    %cst_71 = arith.constant dense<0.000000e+00> : vector<8x128xf32>
    %119 = tpu.matmul %116, %118, %cst_71 {dimension_numbers = #tpu.dot_dimension_numbers<[1], [0], [0], [1], [0, 0, 1, 1], [], []>} : vector<8x128xf32>, vector<128x128xf32>, vector<8x128xf32> -> vector<8x128xf32>
    %c0_72 = arith.constant 0 : index
    %c0_73 = arith.constant 0 : index
    %c0_74 = arith.constant 0 : index
    %120 = vector.load %arg23[%c0_72, %c0_73, %c0_74] : memref<1x1x128xf32, #tpu.memory_space<vmem>>, vector<1x1x128xf32>
    %121 = vector.shape_cast %120 : vector<1x1x128xf32> to vector<1x128xf32>
    %122 = vector.broadcast %121 : vector<1x128xf32> to vector<8x128xf32>
    %123 = arith.addf %119, %122 : vector<8x128xf32>
    %124 = vector.broadcast %15 : vector<1x128xf32> to vector<8x128xf32>
    %125 = arith.mulf %100, %124 : vector<8x128xf32>
    %126 = vector.broadcast %7 : vector<8x1xf32> to vector<8x128xf32>
    %127 = arith.mulf %125, %126 : vector<8x128xf32>
    %cst_75 = arith.constant 1.000000e+00 : f32
    %128 = vector.broadcast %cst_75 : f32 to vector<8x128xf32>
    %129 = arith.mulf %127, %128 : vector<8x128xf32>
    %130 = arith.addf %4, %123 : vector<8x128xf32>
    %131 = arith.addf %130, %129 : vector<8x128xf32>
    %c0_76 = arith.constant 0 : index
    %c0_77 = arith.constant 0 : index
    %c0_78 = arith.constant 0 : index
    %132 = vector.load %arg24[%c0_76, %c0_77, %c0_78] : memref<1x8x128xf32, #tpu.memory_space<vmem>>, vector<1x8x128xf32>
    %133 = vector.shape_cast %132 : vector<1x8x128xf32> to vector<8x128xf32>
    %134 = vector.shape_cast %131 : vector<8x128xf32> to vector<1x8x128xf32>
    tpu.vector_store %arg24[%c0_76, %c0_77, %c0_78], %134 {strides = array<i32>} : memref<1x8x128xf32, #tpu.memory_space<vmem>>, vector<1x8x128xf32>,
    return
  }
  func.func @transform_0(%arg0: i32, %arg1: i32) -> (i32, i32, i32) {
    %c0_i32 = arith.constant 0 : i32
    %c0_i32_0 = arith.constant 0 : i32
    %c0_i32_1 = arith.constant 0 : i32
    return %arg0, %c0_i32, %c0_i32_0 : i32, i32, i32
  }
  func.func @transform_1(%arg0: i32, %arg1: i32) -> (i32, i32, i32) {
    %c0_i32 = arith.constant 0 : i32
    %c0_i32_0 = arith.constant 0 : i32
    %c0_i32_1 = arith.constant 0 : i32
    return %arg0, %c0_i32, %c0_i32_0 : i32, i32, i32
  }
  func.func @transform_2(%arg0: i32, %arg1: i32) -> (i32, i32, i32) {
    %c0_i32 = arith.constant 0 : i32
    %c0_i32_0 = arith.constant 0 : i32
    %c0_i32_1 = arith.constant 0 : i32
    return %arg0, %c0_i32, %c0_i32_0 : i32, i32, i32
  }
  func.func @transform_3(%arg0: i32, %arg1: i32) -> (i32, i32) {
    %c0_i32 = arith.constant 0 : i32
    %c0_i32_0 = arith.constant 0 : i32
    %c0_i32_1 = arith.constant 0 : i32
    return %c0_i32, %c0_i32_0 : i32, i32
  }
  func.func @transform_4(%arg0: i32, %arg1: i32) -> (i32, i32) {
    %c0_i32 = arith.constant 0 : i32
    %c0_i32_0 = arith.constant 0 : i32
    %c0_i32_1 = arith.constant 0 : i32
    return %c0_i32, %c0_i32_0 : i32, i32
  }
  func.func @transform_5(%arg0: i32, %arg1: i32) -> (i32, i32) {
    %c0_i32 = arith.constant 0 : i32
    %c0_i32_0 = arith.constant 0 : i32
    %c0_i32_1 = arith.constant 0 : i32
    return %c0_i32, %c0_i32_0 : i32, i32
  }
  func.func @transform_6(%arg0: i32, %arg1: i32) -> (i32, i32) {
    %c0_i32 = arith.constant 0 : i32
    %c0_i32_0 = arith.constant 0 : i32
    %c0_i32_1 = arith.constant 0 : i32
    return %c0_i32, %c0_i32_0 : i32, i32
  }
  func.func @transform_7(%arg0: i32, %arg1: i32) -> (i32, i32) {
    %c0_i32 = arith.constant 0 : i32
    %c0_i32_0 = arith.constant 0 : i32
    %c0_i32_1 = arith.constant 0 : i32
    return %c0_i32, %c0_i32_0 : i32, i32
  }
  func.func @transform_8(%arg0: i32, %arg1: i32) -> (i32, i32, i32) {
    %c0_i32 = arith.constant 0 : i32
    %c0_i32_0 = arith.constant 0 : i32
    %c0_i32_1 = arith.constant 0 : i32
    return %arg1, %c0_i32, %c0_i32_0 : i32, i32, i32
  }
  func.func @transform_9(%arg0: i32, %arg1: i32) -> (i32, i32, i32) {
    %c0_i32 = arith.constant 0 : i32
    %c0_i32_0 = arith.constant 0 : i32
    %c0_i32_1 = arith.constant 0 : i32
    return %arg1, %c0_i32, %c0_i32_0 : i32, i32, i32
  }
  func.func @transform_10(%arg0: i32, %arg1: i32) -> (i32, i32, i32) {
    %c0_i32 = arith.constant 0 : i32
    %c0_i32_0 = arith.constant 0 : i32
    %c0_i32_1 = arith.constant 0 : i32
    return %arg1, %c0_i32, %c0_i32_0 : i32, i32, i32
  }
  func.func @transform_11(%arg0: i32, %arg1: i32) -> (i32, i32, i32) {
    %c0_i32 = arith.constant 0 : i32
    %c0_i32_0 = arith.constant 0 : i32
    %c0_i32_1 = arith.constant 0 : i32
    return %arg1, %c0_i32, %c0_i32_0 : i32, i32, i32
  }
  func.func @transform_12(%arg0: i32, %arg1: i32) -> (i32, i32, i32) {
    %c0_i32 = arith.constant 0 : i32
    %c0_i32_0 = arith.constant 0 : i32
    %c0_i32_1 = arith.constant 0 : i32
    return %arg1, %c0_i32, %c0_i32_0 : i32, i32, i32
  }
  func.func @transform_13(%arg0: i32, %arg1: i32) -> (i32, i32, i32) {
    %c0_i32 = arith.constant 0 : i32
    %c0_i32_0 = arith.constant 0 : i32
    %c0_i32_1 = arith.constant 0 : i32
    return %arg1, %c0_i32, %c0_i32_0 : i32, i32, i32
  }
  func.func @transform_14(%arg0: i32, %arg1: i32) -> (i32, i32, i32) {
    %c0_i32 = arith.constant 0 : i32
    %c0_i32_0 = arith.constant 0 : i32
    %c0_i32_1 = arith.constant 0 : i32
    return %arg1, %c0_i32, %c0_i32_0 : i32, i32, i32
  }
  func.func @transform_15(%arg0: i32, %arg1: i32) -> (i32, i32, i32) {
    %c0_i32 = arith.constant 0 : i32
    %c0_i32_0 = arith.constant 0 : i32
    %c0_i32_1 = arith.constant 0 : i32
    return %arg1, %c0_i32, %c0_i32_0 : i32, i32, i32
  }
  func.func @transform_16(%arg0: i32, %arg1: i32) -> (i32, i32, i32) {
    %c0_i32 = arith.constant 0 : i32
    %c0_i32_0 = arith.constant 0 : i32
    %c0_i32_1 = arith.constant 0 : i32
    return %arg1, %c0_i32, %c0_i32_0 : i32, i32, i32
  }
  func.func @transform_17(%arg0: i32, %arg1: i32) -> (i32, i32, i32) {
    %c0_i32 = arith.constant 0 : i32
    %c0_i32_0 = arith.constant 0 : i32
    %c0_i32_1 = arith.constant 0 : i32
    return %arg1, %c0_i32, %c0_i32_0 : i32, i32, i32
  }
  func.func @transform_18(%arg0: i32, %arg1: i32) -> (i32, i32, i32) {
    %c0_i32 = arith.constant 0 : i32
    %c0_i32_0 = arith.constant 0 : i32
    %c0_i32_1 = arith.constant 0 : i32
    return %arg1, %c0_i32, %c0_i32_0 : i32, i32, i32
  }
  func.func @transform_19(%arg0: i32, %arg1: i32) -> (i32, i32, i32) {
    %c0_i32 = arith.constant 0 : i32
    %c0_i32_0 = arith.constant 0 : i32
    %c0_i32_1 = arith.constant 0 : i32
    return %arg1, %c0_i32, %c0_i32_0 : i32, i32, i32
  }
  func.func @transform_20(%arg0: i32, %arg1: i32) -> (i32, i32, i32) {
    %c0_i32 = arith.constant 0 : i32
    %c0_i32_0 = arith.constant 0 : i32
    %c0_i32_1 = arith.constant 0 : i32
    return %arg1, %c0_i32, %c0_i32_0 : i32, i32, i32
  }
  func.func @transform_21(%arg0: i32, %arg1: i32) -> (i32, i32, i32) {
    %c0_i32 = arith.constant 0 : i32
    %c0_i32_0 = arith.constant 0 : i32
    %c0_i32_1 = arith.constant 0 : i32
    return %arg1, %c0_i32, %c0_i32_0 : i32, i32, i32
  }
  func.func @transform_22(%arg0: i32, %arg1: i32) -> (i32, i32, i32) {
    %c0_i32 = arith.constant 0 : i32
    %c0_i32_0 = arith.constant 0 : i32
    %c0_i32_1 = arith.constant 0 : i32
    return %arg0, %c0_i32, %c0_i32_0 : i32, i32, i32
  }
}

</mosaic_0001>

<bundles_post_ra>
// kernel: egnn_pallas.1
= control target key start
LH: loop header
LB: loop body
LE: loop exit
PB: predicated region body
PF: predicated region fallthrough
CT: control target
= control target key end

     0   :  { %s3634_s28 = smov 0   ;;  %s3636_s29 = smov 0   ;;  %s4258_s0 = inlined_call_operand.vmem [shape: f32[2,8,4], index: 0, kind: input, shape index: {}]   ;;  %s4259_s1 = inlined_call_operand.vmem [shape: f32[2,8,128], index: 1, kind: input, shape index: {}]   ;;  %s4260_s2 = inlined_call_operand.vmem [shape: f32[2,56,2], index: 2, kind: input, shape index: {}]   ;;  %s4261_s3 = inlined_call_operand.vmem [shape: bf16[56,8], index: 3, kind: input, shape index: {}]   ;;  %s4262_s4 = inlined_call_operand.vmem [shape: bf16[56,8], index: 4, kind: input, shape index: {}]   ;;  %s4263_s5 = inlined_call_operand.vmem [shape: f32[8,1], index: 5, kind: input, shape index: {}]   ;;  %s4264_s6 = inlined_call_operand.vmem [shape: f32[4,128], index: 6, kind: input, shape index: {}]   ;;  %s4265_s7 = inlined_call_operand.vmem [shape: f32[1,128], index: 7, kind: input, shape index: {}]   ;;  %s4266_s8 = inlined_call_operand.vmem [shape: f32[4,128,128], index: 8, kind: input, shape index: {}]   ;;  %s4267_s9 = inlined_call_operand.vmem [shape: f32[4,128,128], index: 9, kind: input, shape index: {}]   ;;  %s4268_s10 = inlined_call_operand.vmem [shape: f32[4,3,128], index: 10, kind: input, shape index: {}]   ;;  %s4269_s11 = inlined_call_operand.vmem [shape: f32[4,1,128], index: 11, kind: input, shape index: {}]   ;;  %s4270_s12 = inlined_call_operand.vmem [shape: f32[4,128,128], index: 12, kind: input, shape index: {}]   ;;  %s4271_s13 = inlined_call_operand.vmem [shape: f32[4,1,128], index: 13, kind: input, shape index: {}]   ;;  %s4272_s14 = inlined_call_operand.vmem [shape: f32[4,128,128], index: 14, kind: input, shape index: {}]   ;;  %s4273_s15 = inlined_call_operand.vmem [shape: f32[4,1,128], index: 15, kind: input, shape index: {}]   ;;  %s4274_s16 = inlined_call_operand.vmem [shape: f32[4,1,128], index: 16, kind: input, shape index: {}]   ;;  %s4275_s17 = inlined_call_operand.vmem [shape: f32[4,128,128], index: 17, kind: input, shape index: {}]   ;;  %s4276_s18 = inlined_call_operand.vmem [shape: f32[4,128,128], index: 18, kind: input, shape index: {}]   ;;  %s4277_s19 = inlined_call_operand.vmem [shape: f32[4,1,128], index: 19, kind: input, shape index: {}]   ;;  %s4278_s20 = inlined_call_operand.vmem [shape: f32[4,128,128], index: 20, kind: input, shape index: {}]   ;;  %s4279_s21 = inlined_call_operand.vmem [shape: f32[4,1,128], index: 21, kind: input, shape index: {}]   ;;  %s4280_s22 = inlined_call_operand.vmem [shape: f32[2,8,128], index: 22, kind: output, shape index: {}]  }
   0x1   :  { %4290 = sst [smem:[#allocation11_spill]] %s4258_s0  ;;  %s3638_s30 = smov 0  }
   0x2   :  { %4291 = sst [smem:[#allocation12_spill]] %s4259_s1 }
   0x3   :  { %4292 = sst [smem:[#allocation13_spill]] %s4260_s2 }
   0x4   :  { %4293 = sst [smem:[#allocation14_spill]] %s4261_s3  ;;  %s3632_s3 = smov 0  }
   0x5   :  { %4294 = sst [smem:[#allocation15_spill]] %s4262_s4  ;;  %s3640_s4 = smov 0  }
   0x6   :  { %4295 = sst [smem:[#allocation16_spill]] %s4263_s5 }
   0x7   :  { %4296 = sst [smem:[#allocation17_spill]] %s4264_s6 }
   0x8   :  { %4297 = sst [smem:[#allocation18_spill]] %s4265_s7 }
   0x9   :  { %4298 = sst [smem:[#allocation19_spill]] %s4266_s8 }
   0xa   :  { %4299 = sst [smem:[#allocation20_spill]] %s4267_s9 }
   0xb   :  { %4300 = sst [smem:[#allocation21_spill]] %s4268_s10 }
   0xc   :  { %4301 = sst [smem:[#allocation22_spill]] %s4270_s12 }
   0xd   :  { %4302 = sst [smem:[#allocation23_spill]] %s4272_s14 }
   0xe   :  { %4303 = sst [smem:[#allocation24_spill]] %s4274_s16 }
   0xf   :  { %4304 = sst [smem:[#allocation25_spill]] %s4275_s17 }
  0x10   :  { %4305 = sst [smem:[#allocation26_spill]] %s4278_s20 }
  0x11   :  { %4306 = sst [smem:[#allocation27_spill]] %s4279_s21 }
  0x12   :  { %4307 = sst [smem:[#allocation28_spill]] %s4280_s22 }
  0x13 LB: > { %4308 = sst [smem:[#allocation2_spill]] %s3492_s3  ;;  %s41_s0 = sadd.s32 1, %s3500_s29  ;;  %s3508_s4 = sphi %s3640_s4, %s32_s4   ;;  %s3504_s30 = sphi %s3638_s30, %s4352_s30   ;;  %s3500_s29 = sphi %s3636_s29, %s4351_s29   ;;  %s3496_s28 = sphi %s3634_s28, %s4350_s28   ;;  %s3492_s3 = sphi %s3632_s3, %s4349_s3  }
  0x14   : > { %4309 = sst [smem:[#allocation3_spill]] %s3500_s29  ;;  %s44_s23 = sadd.s32 1, %s3504_s30 }
  0x15   : > { %4310 = sst [smem:[#allocation4_spill]] %s3504_s30  ;;  %p42_p0 = scmp.ge.s32.totalorder %s41_s0, 4 }
  0x16   : > { %4311 = sst [smem:[#allocation5_spill]] %s3508_s4  ;;  %p2651_p1 = scmp.ge.s32.totalorder %s3508_s4, 1 }
  0x17   : > { %p769_p2 = scmp.lt.s32.totalorder %s3508_s4, 9  ;;  %s4354_s0 = smov (%p42_p0, %s41_s0), 0 }
  0x18   : > { %4312 = sst [smem:[#allocation6_spill]] %s4354_s0  ;;  %s4356_s23 = smov (!%p42_p0, %s44_s23), %s3504_s30 }
  0x19   : > { %p770_p3 = pnand %p2651_p1, %p769_p2  ;;  %p46_p4 = scmp.ge.s32.totalorder %s4356_s23, 2 }
  0x1b   : > { %s4358_s23 = smov (%p46_p4, %s4356_s23), 0  ;;  %773 = sbr.rel (%p770_p3) target bundleno = 1994 (0x7ca), region = 108 }
  0x1c   : > { %4313 = sst [smem:[#allocation7_spill]] %s4358_s23 }
  0x22   : > { %p895_p5 = scmp.lt.s32.totalorder %s3496_s28, 1  ;;  %p908_p6 = scmp.lt.s32.totalorder %s3492_s3, 3 }
  0x23   : > { %s4314_s26 = sld [smem:[#allocation11_spill]]  ;;  %s4316_s7 = sld [smem:[#allocation13_spill]] }
  0x24   : > { %s4360_s28 = smov (!%p895_p5, %s3496_s28), 1  ;;  %s4317_s8 = sld [smem:[#allocation19_spill]] }
  0x25   : > { %s3666_s1 = scalar_select %p908_p6, %s3492_s3, 3 }
  0x26   : > { %s3668_s5 = sshll.u32 %s4360_s28, 3  ;;  %s3399_s24 = smul.u32 56, %s4360_s28 }
  0x27   : > { %s2708_s22 = sshll.u32 %s3666_s1, 7  ;;  %s4319_s9 = sld [smem:[#allocation20_spill]] }
  0x28   : > { %s2659_s23 = sshll.u32 %s3666_s1, 2  ;;  %s4321_s10 = sld [smem:[#allocation21_spill]] }
  0x29   : > { %s898_s2 = scalar_lea.vmem %s4314_s26, %s3668_s5  ;;  %s3681_s3 = scalar_lea.vmem %s4316_s7, %s3399_s24 }
  0x2a   : > { %s3687_s28 = scalar_lea.vmem %s4317_s8, %s2708_s22  ;;  %s4322_s12 = sld [smem:[#allocation22_spill]] }
  0x2b   : > { %4318 = sst [smem:[#allocation8_spill]] %s3687_s28  ;;  %s4323_s14 = sld [smem:[#allocation23_spill]] }
  0x2c   : > { %s4325_s17 = sld [smem:[#allocation25_spill]]  ;;  %s3734_s6 = scalar_lea.vmem %s4276_s18, %s2708_s22 }
  0x2d   : > { %s3692_s26 = scalar_lea.vmem %s4319_s9, %s2708_s22  ;;  %s4327_s7 = sld [smem:[#allocation26_spill]] }
  0x2e   : > { %4320 = sst [smem:[#allocation9_spill]] %s3692_s26  ;;  %s3702_s24 = scalar_lea.vmem %s4321_s10, %s2659_s23 }
  0x2f   : > { %s4328_s29 = sld [smem:[#allocation27_spill]]  ;;  %s4330_s8 = sld [smem:[#allocation2_spill]] }
  0x30   : > { %s3707_s21 = scalar_lea.vmem %s4322_s12, %s2708_s22  ;;  %s956_s12 = scalar_lea.vmem %s4277_s19, %s3666_s1 }
  0x31   : > { %s3716_s26 = scalar_lea.vmem %s4323_s14, %s2708_s22 }
  0x32   : > { %s3729_s10 = scalar_lea.vmem %s4325_s17, %s2708_s22 }
  0x33   : > { %4326 = sst [smem:[#allocation10_spill]] %s3729_s10  ;;  %s3743_s14 = scalar_lea.vmem %s4327_s7, %s2708_s22 }
  0x34   : > { %s4329_s10 = sld [smem:[#allocation28_spill]] }
  0x35   : > { %s964_s30 = scalar_lea.vmem %s4328_s29, %s3666_s1  ;;  %p2671_p7 = scmp.ne.s32.totalorder %s4330_s8, 0 }
  0x36   : > { %s4331_s25 = sld [smem:[#allocation17_spill]] (!%p2671_p7)  ;;  %vm987_vm0 = vcmask (!%p2671_p7), 1043456   ;;  %v974_v1 = vld [vmem:[%s898_s2] sm:$0xff] (!%p2671_p7)  ;;  %v3510_v2 = vmov (!%p2671_p7), 0.0   ;;  %vm3511_vm1 = vmmov (!%p2671_p7), 0   ;;  %vm983_vm2 = vcmask (!%p2671_p7), 31744  }
  0x37   : > { %973 = sbr.rel (%p2671_p7) target bundleno = 279 (0x117), region = 112  ;;  %2875 = vmatprep.subr.mxu0 (!%p2671_p7), %v3510_v2  ;;  %2877 = vmatprep.mubr.msk.f32.mxu0 (!%p2671_p7), %vm3511_vm1, %v3510_v2  ;;  %s4332_s22 = sld [smem:[#allocation18_spill]] (!%p2671_p7) }
  0x38   : > { %s4333_s0 = sld [smem:[#allocation12_spill]] (!%p2671_p7) }
  0x3a   : > { %s3753_s16 = scalar_lea.vmem %s4329_s10, %s3668_s5 }
  0x3c   : > { %v975_v0 = vld [vmem:[%s4331_s25] sm:$0xf] (!%p2671_p7) }
  0x3d   : > { %2876 = vmatpush3.msk.msra.mxu0 (!%p2671_p7), %vm987_vm0, %v975_v0  ;;  %v2672_v3 = vld [vmem:[%s4332_s22] ss:$0 sm:$0xff] (!%p2671_p7) }
  0x3e   : > { %2878 = vmatmul.mubr.msk.f32.vlgmr.msra.gmra.mrb[0].mxu0 %vm983_vm2, %v974_v1  ;;  %s4334_s27 = scalar_lea.vmem %s4333_s0, %s3668_s5 }
  0x3f   : > { %v1061_v5 = vld [vmem:[%s4334_s27] sm:$0xff] }
 0x111   : > { %v1057_v4 = vpop.f32.mrb[0].mxu0 }
 0x112   : > { %v1058_v6 = vadd.f32 %v2672_v3, %v1057_v4  ;;  %v2879_v7 = vpop.f32.mrb[1].mxu0 }
 0x114   : > { %v1062_v8 = vadd.f32 %v1061_v5, %v1058_v6 }
 0x116   : > { %1063 = vst [vmem:[%s3753_s16] sm:$0xff] %v1062_v8 }
 0x117 PF: > { %vm1119_vm3 = vcmask 1043456   ;;  %s4335_s4 = sld [smem:[#allocation14_spill]]  ;;  %vm1106_vm4 = vcmask 64512   ;;  %s4337_s9 = sld [smem:[#allocation15_spill]]  ;;  %v3512_v18 = vmov 0   ;;  %v1581_v19 = vld [vmem:[%s3681_s3] sm:$0xff] }
 0x118   : > { %s4338_s7 = sld [smem:[#allocation9_spill]]  ;;  %3447 = vset.pattern.permute.xlu1 %v3512_v18  ;;  %3448 = vset.pattern.permute.xlu0 %v3512_v18  ;;  %s4339_s2 = sld [smem:[#allocation8_spill]]  ;;  %v1583_v20 = vld [vmem:[%s3681_s3 + $0x10] sm:$0xff]  ;;  %v1582_v22 = vld [vmem:[%s3681_s3 + $0x8] sm:$0xff]  ;;  %v3513_v24 = vmov 0.0|0.0   ;;  %v1584_v29 = vld [vmem:[%s3681_s3 + $0x18] sm:$0xff] }
 0x119   : > { %1590 = vperm.xlu1 %3447, %v1581_v19   ;;  %1600 = vperm.xlu0 %3448, %v1583_v20   ;;  %v3514_v42 = vmov 1   ;;  %v1585_v50 = vld [vmem:[%s3681_s3 + $0x20] sm:$0xff]  ;;  %v1586_v4 = vld [vmem:[%s3681_s3 + $0x28] sm:$0xff]  ;;  %vm3515_vm5 = vmmov 0   ;;  %s4341_s10 = scalar_lea.vmem %s4271_s13, %s3666_s1  ;;  %s4342_s22 = scalar_lea.vmem %s4273_s15, %s3666_s1 }
 0x11a   : > { %s4343_s0 = sld [smem:[#allocation24_spill]] }
 0x11d   : > { %v1064_v9 = vld [vmem:[%s3753_s16] sm:$0xff]  ;;  %s4336_s20 = smov %s4335_s4  ;;  %v3460_v15 = vld [vmem:[%s4337_s9 + $0x8] sm:$0xff]   ;;  %v3462_v17 = vld [vmem:[%s4337_s9 + $0x10] sm:$0xff]   ;;  %1595 = vperm.xlu1 %3447, %v1582_v22   ;;  %1605 = vperm.xlu0 %3448, %v1584_v29  }
 0x11e   : > { %v1087_v10 = vpack.c.bf16 %v1064_v9, %v1064_v9  ;;  %v3457_v11 = vld [vmem:[%s4335_s4] sm:$0xff]   ;;  %v3459_v14 = vld [vmem:[%s4336_s20 + $0x8] sm:$0xff]   ;;  %v3461_v16 = vld [vmem:[%s4336_s20 + $0x10] sm:$0xff]   ;;  %s4345_s4 = sld [smem:[#allocation16_spill]] }
 0x11f   : > { %v3458_v12 = vld [vmem:[%s4337_s9] sm:$0xff]   ;;  %2882 = vmatprep.mubr.msk.bf16.mxu0 %vm1106_vm4, %v3457_v11  ;;  %v3463_v21 = vld [vmem:[%s4336_s20 + $0x18] ss:$0 sps:$4 sm:$0xff]   ;;  %v1334_v25 = vld [vmem:[%s4338_s7 + $0x8] sm:$0xff] }
 0x120   : > { %3397 = vmatprep.subr.msk.bf16.mxu0 %vm1119_vm3, %v1087_v10  ;;  %3398 = vmatprep.subr.msk.bf16.mxu1 %vm1119_vm3, %v1087_v10  ;;  %v1121_v13 = vsel %vm1119_vm3, %v1087_v10, 0  ;;  %v1333_v23 = vld [vmem:[%s4338_s7] sm:$0xff]  ;;  %v1318_v27 = vld [vmem:[%s4339_s2 + $0x8] sm:$0xff]  ;;  %v3464_v28 = vld [vmem:[%s4337_s9 + $0x18] ss:$0 sps:$4 sm:$0xff]   ;;  %s4344_s27 = scalar_lea.vmem %s4343_s0, %s3666_s1 }
 0x121   : > { %2881 = vmatpush3.bf16.msra.mxu0 %v1121_v13  ;;  %2891 = vmatpush3.bf16.msra.mxu1 %v1121_v13  ;;  %v1317_v26 = vld [vmem:[%s4339_s2] sm:$0xff]  ;;  %v3230_v30 = vpack.c.bf16 %v1334_v25, %v1333_v23  ;;  %v1335_v32 = vld [vmem:[%s4338_s7 + $0x10] sm:$0xff]  ;;  %v1336_v33 = vld [vmem:[%s4338_s7 + $0x18] sm:$0xff]  ;;  %v3516_v13 = vmov 0.0  }
 0x122   : > { %2892 = vmatprep.mubr.msk.bf16.mxu1 %vm1106_vm4, %v3458_v12  ;;  %3229 = vmatprep.subr.bf16.mxu0 %v3513_v24  ;;  %v3254_v31 = vpack.c.bf16 %v1318_v27, %v1317_v26  ;;  %v1319_v34 = vld [vmem:[%s4339_s2 + $0x10] sm:$0xff]  ;;  %v1320_v35 = vld [vmem:[%s4339_s2 + $0x18] sm:$0xff]  ;;  %v3233_v36 = vpack.c.bf16 %v1336_v33, %v1335_v32  ;;  %v1337_v38 = vld [vmem:[%s4338_s7 + $0x20] sm:$0xff] }
 0x123   : > { %3253 = vmatprep.subr.bf16.mxu1 %v3513_v24  ;;  %v3257_v37 = vpack.c.bf16 %v1320_v35, %v1319_v34  ;;  %v1338_v39 = vld [vmem:[%s4338_s7 + $0x28] sm:$0xff]  ;;  %v1321_v40 = vld [vmem:[%s4339_s2 + $0x20] sm:$0xff]  ;;  %3449 = vset.pattern.permute.xlu1 %v3514_v42  ;;  %v1339_v45 = vld [vmem:[%s4338_s7 + $0x30] sm:$0xff] }
 0x124   : > { %2883 = vmatmul.mubr.msk.bf16.vlgmr.msra.gmra.mrb[0].mxu0 %vm1106_vm4, %v3459_v14  ;;  %2893 = vmatmul.mubr.msk.bf16.vlgmr.msra.gmra.mrb[0].mxu1 %vm1106_vm4, %v3460_v15  ;;  %v1322_v41 = vld [vmem:[%s4339_s2 + $0x28] sm:$0xff]  ;;  %v3236_v43 = vpack.c.bf16 %v1338_v39, %v1337_v38  ;;  %v1340_v46 = vld [vmem:[%s4338_s7 + $0x38] sm:$0xff]  ;;  %v1323_v47 = vld [vmem:[%s4339_s2 + $0x30] sm:$0xff]  ;;  %v1080_v14 = vlaneseq }
 0x125   : > { %2886 = vmatprep.mubr.msk.bf16.mxu0 %vm1106_vm4, %v3461_v16  ;;  %2896 = vmatprep.mubr.msk.bf16.mxu1 %vm1106_vm4, %v3462_v17  ;;  %v3260_v44 = vpack.c.bf16 %v1322_v41, %v1321_v40  ;;  %v1324_v48 = vld [vmem:[%s4339_s2 + $0x38] sm:$0xff]  ;;  %v3239_v49 = vpack.c.bf16 %v1340_v46, %v1339_v45  ;;  %v1341_v52 = vld [vmem:[%s4338_s7 + $0x40] sm:$0xff]  ;;  %v1342_v53 = vld [vmem:[%s4338_s7 + $0x48] sm:$0xff] }
 0x126   : > { %3231 = vmatpush3.bf16.msra.mxu0 %v3230_v30  ;;  %3255 = vmatpush3.bf16.msra.mxu1 %v3254_v31  ;;  %v3263_v51 = vpack.c.bf16 %v1324_v48, %v1323_v47  ;;  %v1325_v54 = vld [vmem:[%s4339_s2 + $0x40] sm:$0xff]  ;;  %v1326_v55 = vld [vmem:[%s4339_s2 + $0x48] sm:$0xff]  ;;  %v3242_v56 = vpack.c.bf16 %v1342_v53, %v1341_v52  ;;  %v1343_v58 = vld [vmem:[%s4338_s7 + $0x50] sm:$0xff]  ;;  %v1081_v15 = vand.u32 127, %v1080_v14 }
 0x127   : > { %3232 = vmatprep.subr.bf16.mxu0 %v3513_v24  ;;  %3256 = vmatprep.subr.bf16.mxu1 %v3513_v24  ;;  %v3266_v57 = vpack.c.bf16 %v1326_v55, %v1325_v54  ;;  %v1344_v59 = vld [vmem:[%s4338_s7 + $0x58] sm:$0xff]  ;;  %v1327_v60 = vld [vmem:[%s4339_s2 + $0x50] sm:$0xff]  ;;  %v1345_v0 = vld [vmem:[%s4338_s7 + $0x60] sm:$0xff] }
 0x128   : > { %3450 = vset.pattern.permute.xlu0 %v3514_v42  ;;  %1650 = vperm.xlu1 %3449, %v1583_v20   ;;  %v1328_v61 = vld [vmem:[%s4339_s2 + $0x58] sm:$0xff]  ;;  %v3245_v62 = vpack.c.bf16 %v1344_v59, %v1343_v58  ;;  %v1346_v1 = vld [vmem:[%s4338_s7 + $0x68] sm:$0xff]  ;;  %v1329_v2 = vld [vmem:[%s4339_s2 + $0x60] sm:$0xff]  ;;  %vm1082_vm6 = vcmp.ge.s32.totalorder %v1081_v15, 32  ;;  %vm1083_vm7 = vcmp.lt.s32.totalorder %v1081_v15, 35 }
 0x129   : > { %1642 = vperm.xlu0 %3450, %v1581_v19   ;;  %v3269_v63 = vpack.c.bf16 %v1328_v61, %v1327_v60  ;;  %v1330_v3 = vld [vmem:[%s4339_s2 + $0x68] sm:$0xff]  ;;  %v3248_v5 = vpack.c.bf16 %v1346_v1, %v1345_v0  ;;  %v1347_v7 = vld [vmem:[%s4338_s7 + $0x70] sm:$0xff]  ;;  %v1348_v8 = vld [vmem:[%s4338_s7 + $0x78] sm:$0xff] }
 0x12a   : > { %3234 = vmatpush3.bf16.msra.mxu0 %v3233_v36  ;;  %3258 = vmatpush3.bf16.msra.mxu1 %v3257_v37  ;;  %v3272_v6 = vpack.c.bf16 %v1330_v3, %v1329_v2  ;;  %v1331_v9 = vld [vmem:[%s4339_s2 + $0x70] sm:$0xff]  ;;  %v1332_v10 = vld [vmem:[%s4339_s2 + $0x78] sm:$0xff]  ;;  %v3251_v11 = vpack.c.bf16 %v1348_v8, %v1347_v7  ;;  %vm1084_vm8 = vmand %vm1082_vm6, %vm1083_vm7 }
 0x12b   : > { %3235 = vmatprep.subr.bf16.mxu0 %v3513_v24  ;;  %3259 = vmatprep.subr.bf16.mxu1 %v3513_v24  ;;  %v3275_v12 = vpack.c.bf16 %v1332_v10, %v1331_v9  ;;  %v3875_v19 = vsel %vm1084_vm8, 1.0, %v3516_v13  ;;  %v1709_v58 = vld [vmem:[%s3707_s21 + $0x8] sm:$0xff]  ;;  %v1710_v59 = vld [vmem:[%s3707_s21 + $0x10] sm:$0xff]  ;;  %v1711_v61 = vld [vmem:[%s3707_s21 + $0x18] sm:$0xff] }
 0x12c   : > { %2887 = vmatmul.mubr.msk.bf16.gmra.mrb[4].mxu0 %vm1106_vm4, %v3463_v21  ;;  %2897 = vmatmul.mubr.msk.bf16.gmra.mrb[4].mxu1 %vm1106_vm4, %v3464_v28  ;;  %v1713_v0 = vld [vmem:[%s3707_s21 + $0x28] sm:$0xff]  ;;  %v1714_v2 = vld [vmem:[%s3707_s21 + $0x30] sm:$0xff]  ;;  %v1715_v3 = vld [vmem:[%s3707_s21 + $0x38] sm:$0xff] }
 0x12d   : > { %1654 = vperm.xlu1 %3449, %v1584_v29   ;;  %1646 = vperm.xlu0 %3450, %v1582_v22   ;;  %v1718_v7 = vld [vmem:[%s3707_s21 + $0x50] sm:$0xff]  ;;  %v1719_v8 = vld [vmem:[%s3707_s21 + $0x58] sm:$0xff]  ;;  %v1720_v10 = vld [vmem:[%s3707_s21 + $0x60] sm:$0xff] }
 0x12e   : > { %3237 = vmatpush3.bf16.msra.mxu0 %v3236_v43  ;;  %3261 = vmatpush3.bf16.msra.mxu1 %v3260_v44  ;;  %v3293_v9 = vpack.c.bf16 %v1719_v8, %v1718_v7  ;;  %v1722_v15 = vld [vmem:[%s3707_s21 + $0x70] sm:$0xff] }
 0x12f   : > { %3238 = vmatprep.subr.bf16.mxu0 %v3513_v24  ;;  %3262 = vmatprep.subr.bf16.mxu1 %v3513_v24 }
 0x130   : > { %2932 = vmatprep.mubr.msk.f32.mxu0 %vm3515_vm5, %v3516_v13  ;;  %2985 = vmatprep.mubr.msk.f32.mxu1 %vm3515_vm5, %v3516_v13 }
 0x131   : > { %3451 = vset.pattern.permute.xlu1 %v3512_v18 }
 0x132   : > { %1610 = vperm.xlu1 %3451, %v1585_v50   ;;  %3240 = vmatpush3.bf16.msra.mxu0 %v3239_v49 }
 0x133   : > { %3264 = vmatpush3.bf16.msra.mxu1 %v3263_v51  ;;  %3241 = vmatprep.subr.bf16.mxu0 %v3513_v24 }
 0x134   : > { %3265 = vmatprep.subr.bf16.mxu1 %v3513_v24 }
 0x136   : > { %3452 = vset.pattern.permute.xlu1 %v3514_v42  ;;  %3243 = vmatpush3.bf16.msra.mxu0 %v3242_v56  ;;  %v1587_v56 = vld [vmem:[%s3681_s3 + $0x30] sm:$0xff] }
 0x137   : > { %1658 = vperm.xlu1 %3452, %v1585_v50   ;;  %3267 = vmatpush3.bf16.msra.mxu1 %v3266_v57  ;;  %v1708_v57 = vld [vmem:[%s3707_s21] sm:$0xff] }
 0x138   : > { %3244 = vmatprep.subr.bf16.mxu0 %v3513_v24  ;;  %3268 = vmatprep.subr.bf16.mxu1 %v3513_v24  ;;  %v3278_v60 = vpack.c.bf16 %v1709_v58, %v1708_v57 }
 0x13a   : > { %3246 = vmatpush3.bf16.msra.mxu0 %v3245_v62  ;;  %v3281_v62 = vpack.c.bf16 %v1711_v61, %v1710_v59 }
 0x13b   : > { %3453 = vset.pattern.permute.xlu1 %v3512_v18  ;;  %3270 = vmatpush3.bf16.msra.mxu1 %v3269_v63  ;;  %v1712_v63 = vld [vmem:[%s3707_s21 + $0x20] sm:$0xff] }
 0x13c   : > { %1615 = vperm.xlu1 %3453, %v1586_v4   ;;  %3247 = vmatprep.subr.bf16.mxu0 %v3513_v24  ;;  %v3284_v1 = vpack.c.bf16 %v1713_v0, %v1712_v63  ;;  %v1316_v63 = vld [vmem:[%s3702_s24] sm:$0x7]  ;;  %s4340_s24 = scalar_lea.vmem %s4269_s11, %s3666_s1 }
 0x13d   : > { %3271 = vmatprep.subr.bf16.mxu1 %v3513_v24 }
 0x13e   : > { %3249 = vmatpush3.bf16.msra.mxu0 %v3248_v5  ;;  %v1716_v5 = vld [vmem:[%s3707_s21 + $0x40] sm:$0xff] }
 0x13f   : > { %3273 = vmatpush3.bf16.msra.mxu1 %v3272_v6  ;;  %3250 = vmatprep.subr.bf16.mxu0 %v3513_v24  ;;  %v1717_v6 = vld [vmem:[%s3707_s21 + $0x48] sm:$0xff] }
 0x140   : > { %3454 = vset.pattern.permute.xlu1 %v3514_v42  ;;  %3274 = vmatprep.subr.bf16.mxu1 %v3513_v24 }
 0x141   : > { %1662 = vperm.xlu1 %3454, %v1586_v4   ;;  %v3287_v4 = vpack.c.bf16 %v1715_v3, %v1714_v2 }
 0x142   : > { %3252 = vmatpush3.bf16.msra.mxu0 %v3251_v11  ;;  %v1721_v11 = vld [vmem:[%s3707_s21 + $0x68] sm:$0xff] }
 0x143   : > { %3276 = vmatpush3.bf16.msra.mxu1 %v3275_v12  ;;  %3277 = vmatprep.subr.bf16.mxu0 %v3513_v24  ;;  %v3296_v12 = vpack.c.bf16 %v1721_v11, %v1720_v10  ;;  %v4013_v11 = vld [vmem:[%s4340_s24] ss:$0 sm:$0xff] }
 0x144   : > { %3301 = vmatprep.subr.bf16.mxu1 %v3513_v24 }
 0x145   : > { %3455 = vset.pattern.permute.xlu1 %v3512_v18 }
 0x1f7   : > { %v2884_v16 = vpop.f32.mrb[0].mxu0  ;;  %v2894_v17 = vpop.f32.mrb[0].mxu1 }
 0x1f8   : > { %v1283_v20 = vsub.f32 %v2884_v16, %v2894_v17  ;;  %v1157_v21 = vpop.f32.mrb[1].mxu0  ;;  %v1251_v22 = vpop.f32.mrb[1].mxu1 }
 0x1f9   : > { %v1281_v23 = vsub.f32 %v1157_v21, %v1251_v22  ;;  %v2885_v25 = vpop.f32.mrb[2].mxu0  ;;  %v2895_v26 = vpop.f32.mrb[2].mxu1  ;;  %2933 = vmatmul.mubr.f32.vlgmr.msra.gmra.mrb[8].mxu0 %v1251_v22  ;;  %2986 = vmatmul.mubr.f32.vlgmr.msra.gmra.mrb[8].mxu1 %v1157_v21  ;;  %v1853_v21 = vld [vmem:[%s3716_s26 + $0x8] sm:$0xff]  ;;  %v1854_v22 = vld [vmem:[%s3716_s26 + $0x10] sm:$0xff] }
 0x1fa   : > { %v1284_v27 = vsub.f32 %v2885_v25, %v2895_v26  ;;  %v1160_v28 = vpop.f32.mrb[3].mxu0  ;;  %v1254_v29 = vpop.f32.mrb[3].mxu1  ;;  %2935 = vmatprep.mubr.msk.f32.mxu0 %vm3515_vm5, %v3516_v13  ;;  %2988 = vmatprep.mubr.msk.f32.mxu1 %vm3515_vm5, %v3516_v13  ;;  %v3882_v30 = vmul.f32 %v3875_v19, %v1283_v20  ;;  %v1852_v20 = vld [vmem:[%s3716_s26] sm:$0xff] }
 0x1fb   : > { %v1282_v31 = vsub.f32 %v1160_v28, %v1254_v29  ;;  %v3885_v32 = vmul.f32 %v3875_v19, %v1281_v23  ;;  %3279 = vmatpush3.bf16.msra.mxu0 %v3278_v60  ;;  %v3302_v23 = vpack.c.bf16 %v1853_v21, %v1852_v20  ;;  %v1550_v60 = vshrl.u32 %v1080_v14, 7 }
 0x1fc   : > { %v1297_v33 = vmul.f32 %v3882_v30, %v3882_v30  ;;  %v3892_v35 = vmul.f32 %v3875_v19, %v1284_v27  ;;  %3280 = vmatprep.subr.bf16.mxu0 %v3513_v24  ;;  %v1856_v27 = vld [vmem:[%s3716_s26 + $0x20] sm:$0xff] }
 0x1fd   : > { %2936 = vmatmul.mubr.f32.gmra.mrb[10].mxu0 %v1254_v29  ;;  %2989 = vmatmul.mubr.f32.gmra.mrb[10].mxu1 %v1160_v28  ;;  %v1295_v34 = vmul.f32 %v3885_v32, %v3885_v32  ;;  %v3901_v45 = vmul.f32 %v3875_v19, %v1282_v31  ;;  %v1857_v28 = vld [vmem:[%s3716_s26 + $0x28] sm:$0xff]  ;;  %v1858_v31 = vld [vmem:[%s3716_s26 + $0x30] sm:$0xff] }
 0x1fe   : > { %1306 = vadd.xlane.f32.xlu1 %v1297_v33  ;;  %2938 = vmatprep.mubr.msk.f32.mxu0 %vm3515_vm5, %v3516_v13  ;;  %v1298_v41 = vmul.f32 %v3892_v35, %v3892_v35  ;;  %v3308_v29 = vpack.c.bf16 %v1857_v28, %v1856_v27  ;;  %v1859_v33 = vld [vmem:[%s3716_s26 + $0x38] sm:$0xff] }
 0x1ff   : > { %1302 = vadd.xlane.f32.xlu0 %v1295_v34  ;;  %2991 = vmatprep.mubr.msk.f32.mxu1 %vm3515_vm5, %v3516_v13  ;;  %v2888_v36 = vpop.f32.mrb[4].mxu0  ;;  %v2898_v37 = vpop.f32.mrb[4].mxu1  ;;  %v1296_v51 = vmul.f32 %v3901_v45, %v3901_v45  ;;  %v3311_v34 = vpack.c.bf16 %v1859_v33, %v1858_v31 }
 0x200   : > { %v1287_v38 = vsub.f32 %v2888_v36, %v2898_v37  ;;  %v1267_v39 = vpop.f32.mrb[5].mxu1  ;;  %v1173_v40 = vpop.f32.mrb[5].mxu0  ;;  %3282 = vmatpush3.bf16.msra.mxu0 %v3281_v62  ;;  %3303 = vmatpush3.bf16.msra.mxu1 %v3302_v23  ;;  %v1551_v62 = vsub.s32 0, %v1550_v60 }
 0x201   : > { %2939 = vmatmul.mubr.f32.gmra.mrb[12].mxu0 %v2894_v17  ;;  %2992 = vmatmul.mubr.f32.gmra.mrb[12].mxu1 %v2884_v16  ;;  %v1285_v42 = vsub.f32 %v1173_v40, %v1267_v39  ;;  %v2889_v43 = vpop.f32.mrb[6].mxu0  ;;  %v2899_v44 = vpop.f32.mrb[6].mxu1  ;;  %v1723_v16 = vld [vmem:[%s3707_s21 + $0x78] sm:$0xff] }
 0x202   : > { %2941 = vmatprep.mubr.msk.f32.mxu0 %vm3515_vm5, %v3516_v13  ;;  %2994 = vmatprep.mubr.msk.f32.mxu1 %vm3515_vm5, %v3516_v13  ;;  %v1270_v46 = vpop.f32.mrb[7].mxu1  ;;  %v1176_v47 = vpop.f32.mrb[7].mxu0  ;;  %v3911_v50 = vmul.f32 %v3875_v19, %v1287_v38  ;;  %v3299_v17 = vpack.c.bf16 %v1723_v16, %v1722_v15  ;;  %v1865_v43 = vld [vmem:[%s3716_s26 + $0x68] sm:$0xff]  ;;  %v4003_v3 = vrot.slane %v1316_v63, %v1551_v62 }
 0x203   : > { %1308 = vadd.xlane.f32.xlu0 %v1298_v41  ;;  %v1286_v48 = vsub.f32 %v1176_v47, %v1270_v46  ;;  %v3908_v49 = vmul.f32 %v3875_v19, %v1285_v42  ;;  %3283 = vmatprep.subr.bf16.mxu0 %v3513_v24  ;;  %v1864_v42 = vld [vmem:[%s3716_s26 + $0x60] sm:$0xff] }
 0x204   : > { %v1301_v54 = vmul.f32 %v3911_v50, %v3911_v50  ;;  %3285 = vmatpush3.bf16.msra.mxu0 %v3284_v1  ;;  %3304 = vmatprep.subr.bf16.mxu1 %v3513_v24  ;;  %v3320_v44 = vpack.c.bf16 %v1865_v43, %v1864_v42  ;;  %v1625_v1 = vsub.s32 1, %v1550_v60 }
 0x205   : > { %2942 = vmatmul.mubr.f32.gmra.mrb[14].mxu0 %v2895_v26  ;;  %2995 = vmatmul.mubr.f32.gmra.mrb[14].mxu1 %v2885_v25  ;;  %v1299_v52 = vmul.f32 %v3908_v49, %v3908_v49  ;;  %v3918_v53 = vmul.f32 %v3875_v19, %v1286_v48  ;;  %v1855_v25 = vld [vmem:[%s3716_s26 + $0x18] sm:$0xff]  ;;  %v1601_v48 = vpop.permute.xlu0 %1600 }
 0x206   : > { %2944 = vmatprep.mubr.msk.f32.mxu0 %vm3515_vm5, %v3516_v13  ;;  %2997 = vmatprep.mubr.msk.f32.mxu1 %vm3515_vm5, %v3516_v13  ;;  %v3305_v26 = vpack.c.bf16 %v1855_v25, %v1854_v22 }
 0x207   : > { %1304 = vadd.xlane.f32.xlu0 %v1296_v51  ;;  %1310 = vadd.xlane.f32.xlu1 %v1299_v52  ;;  %v1300_v55 = vmul.f32 %v3918_v53, %v3918_v53 }
 0x208   : > { %3286 = vmatprep.subr.bf16.mxu0 %v3513_v24  ;;  %3306 = vmatpush3.bf16.msra.mxu1 %v3305_v26 }
 0x209   : > { %2945 = vmatmul.mubr.f32.gmra.mrb[16].mxu0 %v1267_v39  ;;  %2998 = vmatmul.mubr.f32.gmra.mrb[16].mxu1 %v1173_v40  ;;  %v1862_v39 = vld [vmem:[%s3716_s26 + $0x50] sm:$0xff]  ;;  %v1863_v40 = vld [vmem:[%s3716_s26 + $0x58] sm:$0xff]  ;;  %v3989_v52 = vpop.permute.xlu0 %1605 }
 0x20a   : > { %2947 = vmatprep.mubr.msk.f32.mxu0 %vm3515_vm5, %v3516_v13  ;;  %3000 = vmatprep.mubr.msk.f32.mxu1 %vm3515_vm5, %v3516_v13  ;;  %v3317_v41 = vpack.c.bf16 %v1863_v40, %v1862_v39 }
 0x20b   : > { %1314 = vadd.xlane.f32.xlu0 %v1301_v54  ;;  %1312 = vadd.xlane.f32.xlu1 %v1300_v55 }
 0x20c   : > { %3288 = vmatpush3.bf16.msra.mxu0 %v3287_v4  ;;  %3307 = vmatprep.subr.bf16.mxu1 %v3513_v24  ;;  %v1671_v4 = vsub.s32 2, %v1550_v60 }
 0x20d   : > { %2948 = vmatmul.mubr.f32.gmra.mrb[18].mxu0 %v1270_v46  ;;  %3001 = vmatmul.mubr.f32.gmra.mrb[18].mxu1 %v1176_v47  ;;  %v1591_v46 = vpop.permute.xlu1 %1590  ;;  %v1643_v55 = vpop.permute.xlu0 %1642 }
 0x20e   : > { %2950 = vmatprep.mubr.msk.f32.mxu0 %vm3515_vm5, %v3516_v13  ;;  %3003 = vmatprep.mubr.msk.f32.mxu1 %vm3515_vm5, %v3516_v13  ;;  %v4015_v16 = vrot.slane %v1316_v63, %v1671_v4 }
 0x20f   : > { %3289 = vmatprep.subr.bf16.mxu0 %v3513_v24  ;;  %3309 = vmatpush3.bf16.msra.mxu1 %v3308_v29 }
 0x210   : > { %3310 = vmatprep.subr.bf16.mxu1 %v3513_v24  ;;  %v1673_v28 = vmul.f32 %v4015_v16, %v1643_v55 }
 0x211   : > { %2951 = vmatmul.mubr.f32.gmra.mrb[20].mxu0 %v2898_v37  ;;  %3004 = vmatmul.mubr.f32.gmra.mrb[20].mxu1 %v2888_v36  ;;  %v1860_v36 = vld [vmem:[%s3716_s26 + $0x40] sm:$0xff]  ;;  %v1861_v37 = vld [vmem:[%s3716_s26 + $0x48] sm:$0xff]  ;;  %v1596_v47 = vpop.permute.xlu1 %1595  ;;  %v1647_v57 = vpop.permute.xlu0 %1646 }
 0x212   : > { %3038 = vmatprep.mubr.msk.f32.mxu0 %vm3515_vm5, %v3516_v13  ;;  %3091 = vmatprep.mubr.msk.f32.mxu1 %vm3515_vm5, %v3516_v13  ;;  %v3314_v38 = vpack.c.bf16 %v1861_v37, %v1860_v36 }
 0x213   : > { %3312 = vmatpush3.bf16.msra.mxu1 %v3311_v34 }
 0x214   : > { %3313 = vmatprep.subr.bf16.mxu1 %v3513_v24 }
 0x215   : > { %v3987_v51 = vpop.permute.xlu1 %1650 }
 0x217   : > { %3315 = vmatpush3.bf16.msra.mxu1 %v3314_v38 }
 0x218   : > { %3316 = vmatprep.subr.bf16.mxu1 %v3513_v24 }
 0x219   : > { %v3991_v54 = vpop.permute.xlu1 %1654 }
 0x21b   : > { %3318 = vmatpush3.bf16.msra.mxu1 %v3317_v41 }
 0x21c   : > { %1620 = vperm.xlu1 %3455, %v1587_v56   ;;  %3319 = vmatprep.subr.bf16.mxu1 %v3513_v24 }
 0x21f   : > { %3321 = vmatpush3.bf16.msra.mxu1 %v3320_v44  ;;  %v1674_v44 = vmul.f32 %v4015_v16, %v1647_v57  ;;  %v1675_v57 = vmul.f32 %v4015_v16, %v3987_v51 }
 0x220   : > { %3322 = vmatprep.subr.bf16.mxu1 %v3513_v24 }
 0x221   : > { %1666 = vperm.xlu0 %3450, %v1587_v56   ;;  %v3993_v56 = vpop.permute.xlu1 %1610 }
 0x225   : > { %3456 = vset.pattern.permute.xlu0 %v3512_v18  ;;  %v3290_v18 = vpack.c.bf16 %v1717_v6, %v1716_v5  ;;  %v3995_v58 = vpop.permute.xlu1 %1658 }
 0x227   : > { %3291 = vmatpush3.bf16.msra.mxu0 %v3290_v18  ;;  %v4005_v18 = vrot.slane %v1316_v63, %v1625_v1 }
 0x228   : > { %3292 = vmatprep.subr.bf16.mxu0 %v3513_v24 }
 0x229   : > { %v3998_v61 = vpop.permute.xlu1 %1615  ;;  %v1627_v21 = vmul.f32 %v4005_v18, %v1591_v46  ;;  %v1628_v34 = vmul.f32 %v4005_v18, %v1596_v47  ;;  %v1629_v60 = vmul.f32 %v4005_v18, %v1601_v48 }
 0x22b   : > { %3294 = vmatpush3.bf16.msra.mxu0 %v3293_v9 }
 0x22c   : > { %3295 = vmatprep.subr.bf16.mxu0 %v3513_v24 }
 0x22d   : > { %v4001_v2 = vpop.permute.xlu1 %1662 }
 0x22f   : > { %3297 = vmatpush3.bf16.msra.mxu0 %v3296_v12 }
 0x230   : > { %3298 = vmatprep.subr.bf16.mxu0 %v3513_v24 }
 0x233   : > { %3300 = vmatpush3.bf16.msra.mxu0 %v3299_v17 }
 0x234   : > { %3112 = vmatprep.subr.bf16.mxu0 %v3516_v13 }
 0x28b   : > { %v1307_v12 = vpop.xlane.xlu1 %1306 }
 0x28c   : > { %v1303_v59 = vpop.xlane.xlu0 %1302  ;;  %v1555_v38 = vmul.f32 %v4003_v3, %v1307_v12 }
 0x28d   : > { %v1553_v7 = vmul.f32 %v4003_v3, %v1303_v59 }
 0x290   : > { %v1309_v0 = vpop.xlane.xlu0 %1308 }
 0x291   : > { %v1556_v47 = vmul.f32 %v4003_v3, %v1309_v0  ;;  %v1630_v0 = vmul.f32 %v4005_v18, %v3989_v52 }
 0x294   : > { %v1305_v10 = vpop.xlane.xlu0 %1304  ;;  %v1311_v29 = vpop.xlane.xlu1 %1310 }
 0x295   : > { %v1554_v22 = vmul.f32 %v4003_v3, %v1305_v10  ;;  %v1557_v12 = vmul.f32 %v4003_v3, %v1311_v29  ;;  %v1631_v29 = vmul.f32 %v4005_v18, %v3993_v56 }
 0x2cc   : > { %v1415_v5 = vpop.f32.mrb[8].mxu0  ;;  %v1515_v6 = vpop.f32.mrb[8].mxu1 }
 0x2cd   : > { %v1516_v8 = vadd.f32 %v1515_v6, %v1415_v5  ;;  %v2934_v14 = vpop.f32.mrb[9].mxu0  ;;  %v2987_v9 = vpop.f32.mrb[9].mxu1 }
 0x2ce   : > { %v1313_v14 = vpop.xlane.xlu1 %1312 }
 0x2cf   : > { %v1560_v15 = vadd.f32 %v1553_v7, %v1516_v8 }
 0x2d0   : > { %v1420_v17 = vpop.f32.mrb[10].mxu0  ;;  %v1520_v20 = vpop.f32.mrb[10].mxu1 }
 0x2d1   : > { %v1574_v23 = vadd.f32 %v4013_v11, %v1560_v15  ;;  %v1521_v25 = vadd.f32 %v1520_v20, %v1420_v17  ;;  %v2937_v26 = vpop.f32.mrb[11].mxu0  ;;  %v2990_v27 = vpop.f32.mrb[11].mxu1 }
 0x2d2   : > { %v1676_v26 = vmul.f32 %v4015_v16, %v3991_v54  ;;  %v1315_v27 = vpop.xlane.xlu0 %1314 }
 0x2d3   : > { %v1634_v31 = vadd.f32 %v1627_v21, %v1574_v23  ;;  %v1561_v33 = vadd.f32 %v1554_v22, %v1521_v25 }
 0x2d4   : > { %v1425_v36 = vpop.f32.mrb[12].mxu0  ;;  %v1525_v37 = vpop.f32.mrb[12].mxu1 }
 0x2d5   : > { %v1680_v39 = vadd.f32 %v1673_v28, %v1634_v31  ;;  %v1575_v40 = vadd.f32 %v4013_v11, %v1561_v33  ;;  %v1526_v41 = vadd.f32 %v1525_v37, %v1425_v36  ;;  %v2940_v42 = vpop.f32.mrb[13].mxu0  ;;  %v2993_v43 = vpop.f32.mrb[13].mxu1  ;;  %v1558_v33 = vmul.f32 %v4003_v3, %v1313_v14 }
 0x2d6   : > { %v1677_v42 = vmul.f32 %v4015_v16, %v3995_v58 }
 0x2d7   : > { %v1635_v46 = vadd.f32 %v1628_v34, %v1575_v40  ;;  %v1562_v59 = vadd.f32 %v1555_v38, %v1526_v41  ;;  %vm1687_vm9 = vcmp.ge.f32.partialorder %v1680_v39, 0.0  ;;  %v1694_v55 = vmul.f32 0.2, %v1680_v39 }
 0x2d8   : > { %v1430_v62 = vpop.f32.mrb[14].mxu0  ;;  %v1530_v63 = vpop.f32.mrb[14].mxu1 }
 0x2d9   : > { %v1576_v1 = vadd.f32 %v4013_v11, %v1562_v59  ;;  %v1531_v4 = vadd.f32 %v1530_v63, %v1430_v62  ;;  %v2943_v5 = vpop.f32.mrb[15].mxu0  ;;  %v2996_v6 = vpop.f32.mrb[15].mxu1  ;;  %v1701_v7 = vsel %vm1687_vm9, %v1680_v39, %v1694_v55  ;;  %v1681_v8 = vadd.f32 %v1674_v44, %v1635_v46 }
 0x2da   : > { %3039 = vmatmul.mubr.f32.vlgmr.msra.gmra.mrb[22].mxu0 %v1701_v7  ;;  %v1621_v46 = vpop.permute.xlu1 %1620  ;;  %v1632_v59 = vmul.f32 %v4005_v18, %v3998_v61  ;;  %v1559_v55 = vmul.f32 %v4003_v3, %v1315_v27  ;;  %v1678_v6 = vmul.f32 %v4015_v16, %v4001_v2  ;;  %v1667_v3 = vpop.permute.xlu0 %1666 }
 0x2db   : > { %v1636_v9 = vadd.f32 %v1629_v60, %v1576_v1  ;;  %v1563_v10 = vadd.f32 %v1556_v47, %v1531_v4  ;;  %3041 = vmatprep.mubr.msk.f32.mxu0 %vm3515_vm5, %v3516_v13  ;;  %vm1688_vm10 = vcmp.ge.f32.partialorder %v1681_v8, 0.0  ;;  %v1695_v48 = vmul.f32 0.2, %v1681_v8 }
 0x2dc   : > { %v1435_v15 = vpop.f32.mrb[16].mxu0  ;;  %v1535_v17 = vpop.f32.mrb[16].mxu1  ;;  %v1633_v7 = vmul.f32 %v4005_v18, %v1621_v46  ;;  %v1679_v2 = vmul.f32 %v4015_v16, %v1667_v3  ;;  %v1866_v16 = vld [vmem:[%s3716_s26 + $0x70] sm:$0xff] }
 0x2dd   : > { %v1577_v20 = vadd.f32 %v4013_v11, %v1563_v10  ;;  %v1536_v21 = vadd.f32 %v1535_v17, %v1435_v15  ;;  %v2946_v51 = vpop.f32.mrb[17].mxu0  ;;  %v2999_v22 = vpop.f32.mrb[17].mxu1  ;;  %v1702_v23 = vsel %vm1688_vm10, %v1681_v8, %v1695_v48  ;;  %v1682_v25 = vadd.f32 %v1675_v57, %v1636_v9  ;;  %v1867_v17 = vld [vmem:[%s3716_s26 + $0x78] sm:$0xff] }
 0x2de   : > { %3042 = vmatmul.mubr.f32.gmra.mrb[24].mxu0 %v1702_v23 }
 0x2df   : > { %v1637_v28 = vadd.f32 %v1630_v0, %v1577_v20  ;;  %v1564_v31 = vadd.f32 %v1557_v12, %v1536_v21  ;;  %3044 = vmatprep.mubr.msk.f32.mxu0 %vm3515_vm5, %v3516_v13  ;;  %vm1689_vm11 = vcmp.ge.f32.partialorder %v1682_v25, 0.0  ;;  %v1696_v52 = vmul.f32 0.2, %v1682_v25  ;;  %v2693_v21 = vld [vmem:[%s4341_s10] ss:$0 sm:$0xff] }
 0x2e0   : > { %v1440_v34 = vpop.f32.mrb[18].mxu0  ;;  %v1540_v36 = vpop.f32.mrb[18].mxu1  ;;  %v3323_v20 = vpack.c.bf16 %v1867_v17, %v1866_v16 }
 0x2e1   : > { %v1578_v37 = vadd.f32 %v4013_v11, %v1564_v31  ;;  %v1541_v38 = vadd.f32 %v1540_v36, %v1440_v34  ;;  %v2949_v54 = vpop.f32.mrb[19].mxu0  ;;  %v3002_v39 = vpop.f32.mrb[19].mxu1  ;;  %v1703_v40 = vsel %vm1689_vm11, %v1682_v25, %v1696_v52  ;;  %v1683_v41 = vadd.f32 %v1676_v26, %v1637_v28 }
 0x2e2   : > { %3045 = vmatmul.mubr.f32.gmra.mrb[26].mxu0 %v1703_v40  ;;  %3324 = vmatpush3.bf16.msra.mxu1 %v3323_v20 }
 0x2e3   : > { %v1638_v43 = vadd.f32 %v1631_v29, %v1578_v37  ;;  %v1565_v44 = vadd.f32 %v1558_v33, %v1541_v38  ;;  %3047 = vmatprep.mubr.msk.f32.mxu0 %vm3515_vm5, %v3516_v13  ;;  %vm1690_vm12 = vcmp.ge.f32.partialorder %v1683_v41, 0.0  ;;  %v1697_v56 = vmul.f32 0.2, %v1683_v41  ;;  %3325 = vmatprep.subr.bf16.mxu1 %v3513_v24 }
 0x2e4   : > { %v1445_v60 = vpop.f32.mrb[20].mxu0  ;;  %v1545_v47 = vpop.f32.mrb[20].mxu1 }
 0x2e5   : > { %v1579_v62 = vadd.f32 %v4013_v11, %v1565_v44  ;;  %v1546_v63 = vadd.f32 %v1545_v47, %v1445_v60  ;;  %v2952_v58 = vpop.f32.mrb[21].mxu0  ;;  %v3005_v1 = vpop.f32.mrb[21].mxu1  ;;  %v1704_v4 = vsel %vm1690_vm12, %v1683_v41, %v1697_v56  ;;  %v1684_v5 = vadd.f32 %v1677_v42, %v1638_v43 }
 0x2e6   : > { %3048 = vmatmul.mubr.f32.gmra.mrb[28].mxu0 %v1704_v4 }
 0x2e7   : > { %v1639_v8 = vadd.f32 %v1632_v59, %v1579_v62  ;;  %v1566_v57 = vadd.f32 %v1559_v55, %v1546_v63  ;;  %3050 = vmatprep.mubr.msk.f32.mxu0 %vm3515_vm5, %v3516_v13  ;;  %vm1691_vm13 = vcmp.ge.f32.partialorder %v1684_v5, 0.0  ;;  %v1698_v61 = vmul.f32 0.2, %v1684_v5 }
 0x2e9   : > { %v1580_v14 = vadd.f32 %v4013_v11, %v1566_v57  ;;  %v1705_v9 = vsel %vm1691_vm13, %v1684_v5, %v1698_v61  ;;  %v1685_v10 = vadd.f32 %v1678_v6, %v1639_v8 }
 0x2ea   : > { %3051 = vmatmul.mubr.f32.gmra.mrb[30].mxu0 %v1705_v9 }
 0x2eb   : > { %v1640_v48 = vadd.f32 %v1633_v7, %v1580_v14  ;;  %3053 = vmatprep.mubr.msk.f32.mxu0 %vm3515_vm5, %v3516_v13  ;;  %vm1692_vm14 = vcmp.ge.f32.partialorder %v1685_v10, 0.0  ;;  %v1699_v18 = vmul.f32 0.2, %v1685_v10  ;;  %v2694_v7 = vld [vmem:[%s4342_s22] ss:$0 sm:$0xff] }
 0x2ec   : > { %v2695_v14 = vld [vmem:[%s4344_s27] ss:$0 sm:$0xff] }
 0x2ed   : > { %v1686_v0 = vadd.f32 %v1679_v2, %v1640_v48  ;;  %v1706_v12 = vsel %vm1692_vm14, %v1685_v10, %v1699_v18 }
 0x2ee   : > { %3054 = vmatmul.mubr.f32.gmra.mrb[32].mxu0 %v1706_v12 }
 0x2ef   : > { %3056 = vmatprep.mubr.msk.f32.mxu0 %vm3515_vm5, %v3516_v13  ;;  %vm1693_vm15 = vcmp.ge.f32.partialorder %v1686_v0, 0.0  ;;  %v1700_v11 = vmul.f32 0.2, %v1686_v0 }
 0x2f1   : > { %v1707_v15 = vsel %vm1693_vm15, %v1686_v0, %v1700_v11 }
 0x2f2   : > { %3057 = vmatmul.mubr.f32.gmra.mrb[34].mxu0 %v1707_v15 }
 0x2f3   : > { %3120 = vmatprep.mubr.msk.bf16.mxu0 %vm3515_vm5, %v3516_v13 }
 0x3ad   : > { %v1797_v51 = vpop.f32.mrb[22].mxu0 }
 0x3ae   : > { %v1798_v22 = vadd.f32 %v2693_v21, %v1797_v51  ;;  %v3040_v23 = vpop.f32.mrb[23].mxu0 }
 0x3b0   : > { %vm1831_vm0 = vcmp.ge.f32.partialorder %v1798_v22, 0.0  ;;  %v1838_v25 = vmul.f32 0.2, %v1798_v22 }
 0x3b1   : > { %v1802_v26 = vpop.f32.mrb[24].mxu0 }
 0x3b2   : > { %v4073_v27 = vsel %vm1831_vm0, %v1798_v22, %v1838_v25  ;;  %v1803_v28 = vadd.f32 %v2693_v21, %v1802_v26  ;;  %v3043_v31 = vpop.f32.mrb[25].mxu0  ;;  %vm2076_vm0 = vcmask 457728  }
 0x3b3   : > { %3092 = vmatmul.mubr.f32.vlgmr.msra.gmra.mrb[22].mxu1 %v4073_v27 }
 0x3b4   : > { %v1839_v52 = vmul.f32 0.2, %v1803_v28  ;;  %3094 = vmatprep.mubr.msk.f32.mxu1 %vm3515_vm5, %v3516_v13  ;;  %vm1832_vm1 = vcmp.ge.f32.partialorder %v1803_v28, 0.0 }
 0x3b5   : > { %v1807_v29 = vpop.f32.mrb[26].mxu0 }
 0x3b6   : > { %v1808_v33 = vadd.f32 %v2693_v21, %v1807_v29  ;;  %v3046_v34 = vpop.f32.mrb[27].mxu0  ;;  %v4078_v36 = vsel %vm1832_vm1, %v1803_v28, %v1839_v52 }
 0x3b7   : > { %3095 = vmatmul.mubr.f32.gmra.mrb[24].mxu1 %v4078_v36 }
 0x3b8   : > { %v1840_v37 = vmul.f32 0.2, %v1808_v33  ;;  %3097 = vmatprep.mubr.msk.f32.mxu1 %vm3515_vm5, %v3516_v13  ;;  %vm1833_vm2 = vcmp.ge.f32.partialorder %v1808_v33, 0.0 }
 0x3b9   : > { %v1812_v38 = vpop.f32.mrb[28].mxu0 }
 0x3ba   : > { %v1813_v54 = vadd.f32 %v2693_v21, %v1812_v38  ;;  %v3049_v39 = vpop.f32.mrb[29].mxu0  ;;  %v4083_v40 = vsel %vm1833_vm2, %v1808_v33, %v1840_v37 }
 0x3bb   : > { %3098 = vmatmul.mubr.f32.gmra.mrb[26].mxu1 %v4083_v40 }
 0x3bc   : > { %v1841_v41 = vmul.f32 0.2, %v1813_v54  ;;  %3100 = vmatprep.mubr.msk.f32.mxu1 %vm3515_vm5, %v3516_v13  ;;  %vm1834_vm4 = vcmp.ge.f32.partialorder %v1813_v54, 0.0 }
 0x3bd   : > { %v1817_v42 = vpop.f32.mrb[30].mxu0 }
 0x3be   : > { %v1818_v43 = vadd.f32 %v2693_v21, %v1817_v42  ;;  %v3052_v44 = vpop.f32.mrb[31].mxu0  ;;  %v4088_v56 = vsel %vm1834_vm4, %v1813_v54, %v1841_v41 }
 0x3bf   : > { %3101 = vmatmul.mubr.f32.gmra.mrb[28].mxu1 %v4088_v56 }
 0x3c0   : > { %v1842_v46 = vmul.f32 0.2, %v1818_v43  ;;  %3103 = vmatprep.mubr.msk.f32.mxu1 %vm3515_vm5, %v3516_v13  ;;  %vm1835_vm6 = vcmp.ge.f32.partialorder %v1818_v43, 0.0 }
 0x3c1   : > { %v1822_v59 = vpop.f32.mrb[32].mxu0 }
 0x3c2   : > { %v1823_v55 = vadd.f32 %v2693_v21, %v1822_v59  ;;  %v3055_v60 = vpop.f32.mrb[33].mxu0  ;;  %v4093_v47 = vsel %vm1835_vm6, %v1818_v43, %v1842_v46 }
 0x3c3   : > { %3104 = vmatmul.mubr.f32.gmra.mrb[30].mxu1 %v4093_v47 }
 0x3c4   : > { %v1843_v62 = vmul.f32 0.2, %v1823_v55  ;;  %3106 = vmatprep.mubr.msk.f32.mxu1 %vm3515_vm5, %v3516_v13  ;;  %vm1836_vm7 = vcmp.ge.f32.partialorder %v1823_v55, 0.0 }
 0x3c5   : > { %v1827_v63 = vpop.f32.mrb[34].mxu0 }
 0x3c6   : > { %v1828_v58 = vadd.f32 %v2693_v21, %v1827_v63  ;;  %v3058_v1 = vpop.f32.mrb[35].mxu0  ;;  %v4098_v4 = vsel %vm1836_vm7, %v1823_v55, %v1843_v62 }
 0x3c7   : > { %3107 = vmatmul.mubr.f32.gmra.mrb[32].mxu1 %v4098_v4  ;;  %v2139_v1 = vld [vmem:[%s3734_s6] sm:$0xff] }
 0x3c8   : > { %v1844_v5 = vmul.f32 0.2, %v1828_v58  ;;  %3109 = vmatprep.mubr.msk.f32.mxu1 %vm3515_vm5, %v3516_v13  ;;  %vm1837_vm8 = vcmp.ge.f32.partialorder %v1828_v58, 0.0 }
 0x3ca   : > { %v4103_v6 = vsel %vm1837_vm8, %v1828_v58, %v1844_v5  ;;  %v1079_v58 = vld [vmem:[%s4345_s4] sm:$0xff]  ;;  %v2140_v5 = vld [vmem:[%s3734_s6 + $0x8] sm:$0xff] }
 0x3cb   : > { %3110 = vmatmul.mubr.f32.gmra.mrb[34].mxu1 %v4103_v6 }
 0x3cc   : > { %3156 = vmatprep.mubr.msk.f32.mxu1 %vm3515_vm5, %v3516_v13 }
 0x486   : > { %v1941_v8 = vpop.f32.mrb[22].mxu1 }
 0x487   : > { %v1942_v57 = vadd.f32 %v2694_v7, %v1941_v8  ;;  %v3093_v61 = vpop.f32.mrb[23].mxu1  ;;  %v2141_v8 = vld [vmem:[%s3734_s6 + $0x10] sm:$0xff] }
 0x489   : > { %v1982_v3 = vmul.f32 0.2, %v1942_v57  ;;  %vm1975_vm9 = vcmp.ge.f32.partialorder %v1942_v57, 0.0 }
 0x48a   : > { %v1946_v9 = vpop.f32.mrb[24].mxu1 }
 0x48b   : > { %v1947_v10 = vadd.f32 %v2694_v7, %v1946_v9  ;;  %v3096_v2 = vpop.f32.mrb[25].mxu1  ;;  %v1989_v48 = vsel %vm1975_vm9, %v1942_v57, %v1982_v3  ;;  %v2142_v57 = vld [vmem:[%s3734_s6 + $0x18] sm:$0xff]  ;;  %v2143_v3 = vld [vmem:[%s3734_s6 + $0x20] sm:$0xff] }
 0x48c   : > { %v2003_v18 = vmul.f32 %v2695_v14, %v1989_v48  ;;  %v3329_v61 = vpack.c.bf16 %v2142_v57, %v2141_v8  ;;  %v2146_v2 = vld [vmem:[%s3734_s6 + $0x38] sm:$0xff] }
 0x48d   : > { %v1983_v0 = vmul.f32 0.2, %v1947_v10  ;;  %vm1976_vm10 = vcmp.ge.f32.partialorder %v1947_v10, 0.0 }
 0x48e   : > { %v1951_v12 = vpop.f32.mrb[26].mxu1  ;;  %2010 = vadd.xlane.f32.xlu1 %v2003_v18  ;;  %v2147_v18 = vld [vmem:[%s3734_s6 + $0x40] sm:$0xff] }
 0x48f   : > { %v1952_v11 = vadd.f32 %v2694_v7, %v1951_v12  ;;  %v3099_v15 = vpop.f32.mrb[27].mxu1  ;;  %v1990_v16 = vsel %vm1976_vm10, %v1947_v10, %v1983_v0  ;;  %v2145_v10 = vld [vmem:[%s3734_s6 + $0x30] sm:$0xff]  ;;  %v2148_v0 = vld [vmem:[%s3734_s6 + $0x48] sm:$0xff] }
 0x490   : > { %v2004_v17 = vmul.f32 %v2695_v14, %v1990_v16  ;;  %v3335_v48 = vpack.c.bf16 %v2146_v2, %v2145_v10  ;;  %v3338_v12 = vpack.c.bf16 %v2148_v0, %v2147_v18  ;;  %v2150_v15 = vld [vmem:[%s3734_s6 + $0x58] sm:$0xff]  ;;  %v3465_v16 = vld [vmem:[%s4336_s20] sm:$0xff]  }
 0x491   : > { %v1984_v20 = vmul.f32 0.2, %v1952_v11  ;;  %vm1977_vm11 = vcmp.ge.f32.partialorder %v1952_v11, 0.0 }
 0x492   : > { %v1956_v21 = vpop.f32.mrb[28].mxu1  ;;  %2012 = vadd.xlane.f32.xlu1 %v2004_v17 }
 0x493   : > { %v1957_v51 = vadd.f32 %v2694_v7, %v1956_v21  ;;  %v3102_v22 = vpop.f32.mrb[29].mxu1  ;;  %v1991_v23 = vsel %vm1977_vm11, %v1952_v11, %v1984_v20  ;;  %v2149_v11 = vld [vmem:[%s3734_s6 + $0x50] sm:$0xff]  ;;  %v2151_v20 = vld [vmem:[%s3734_s6 + $0x60] sm:$0xff]  ;;  %v2152_v21 = vld [vmem:[%s3734_s6 + $0x68] sm:$0xff] }
 0x494   : > { %v2005_v25 = vmul.f32 %v2695_v14, %v1991_v23  ;;  %v3341_v17 = vpack.c.bf16 %v2150_v15, %v2149_v11  ;;  %v3344_v22 = vpack.c.bf16 %v2152_v21, %v2151_v20  ;;  %v2153_v23 = vld [vmem:[%s3734_s6 + $0x70] sm:$0xff] }
 0x495   : > { %v1985_v26 = vmul.f32 0.2, %v1957_v51  ;;  %vm1978_vm12 = vcmp.ge.f32.partialorder %v1957_v51, 0.0 }
 0x496   : > { %v1961_v28 = vpop.f32.mrb[30].mxu1  ;;  %2014 = vadd.xlane.f32.xlu1 %v2005_v25  ;;  %v2154_v25 = vld [vmem:[%s3734_s6 + $0x78] sm:$0xff] }
 0x497   : > { %v1962_v31 = vadd.f32 %v2694_v7, %v1961_v28  ;;  %v3105_v52 = vpop.f32.mrb[31].mxu1  ;;  %v1992_v29 = vsel %vm1978_vm12, %v1957_v51, %v1985_v26  ;;  %v3466_v51 = vld [vmem:[%s4336_s20 + $0x8] sm:$0xff]   ;;  %v3467_v26 = vld [vmem:[%s4336_s20 + $0x10] sm:$0xff]   ;;  %v3347_v28 = vpack.c.bf16 %v2154_v25, %v2153_v23 }
 0x498   : > { %v2006_v33 = vmul.f32 %v2695_v14, %v1992_v29 }
 0x499   : > { %v1986_v34 = vmul.f32 0.2, %v1962_v31  ;;  %vm1979_vm13 = vcmp.ge.f32.partialorder %v1962_v31, 0.0 }
 0x49a   : > { %2016 = vadd.xlane.f32.xlu0 %v2006_v33  ;;  %v1966_v37 = vpop.f32.mrb[32].mxu1 }
 0x49b   : > { %v1967_v38 = vadd.f32 %v2694_v7, %v1966_v37  ;;  %v3108_v54 = vpop.f32.mrb[33].mxu1  ;;  %v1993_v39 = vsel %vm1979_vm13, %v1962_v31, %v1986_v34  ;;  %v3468_v31 = vld [vmem:[%s4336_s20 + $0x18] ss:$0 sps:$4 sm:$0xff]  }
 0x49c   : > { %v2007_v41 = vmul.f32 %v2695_v14, %v1993_v39 }
 0x49d   : > { %v1987_v42 = vmul.f32 0.2, %v1967_v38  ;;  %vm1980_vm14 = vcmp.ge.f32.partialorder %v1967_v38, 0.0 }
 0x49e   : > { %2018 = vadd.xlane.f32.xlu1 %v2007_v41  ;;  %v1971_v43 = vpop.f32.mrb[34].mxu1 }
 0x49f   : > { %v1972_v44 = vadd.f32 %v2694_v7, %v1971_v43  ;;  %v3111_v46 = vpop.f32.mrb[35].mxu1  ;;  %v1994_v59 = vsel %vm1980_vm14, %v1967_v38, %v1987_v42  ;;  %v3326_v7 = vpack.c.bf16 %v2140_v5, %v2139_v1 }
 0x4a0   : > { %v2008_v55 = vmul.f32 %v2695_v14, %v1994_v59 }
 0x4a1   : > { %v1988_v60 = vmul.f32 0.2, %v1972_v44  ;;  %vm1981_vm15 = vcmp.ge.f32.partialorder %v1972_v44, 0.0  ;;  %3327 = vmatpush3.bf16.msra.mxu1 %v3326_v7 }
 0x4a2   : > { %2020 = vadd.xlane.f32.xlu1 %v2008_v55  ;;  %3328 = vmatprep.subr.bf16.mxu1 %v3513_v24 }
 0x4a3   : > { %v1995_v62 = vsel %vm1981_vm15, %v1972_v44, %v1988_v60 }
 0x4a4   : > { %v2009_v63 = vmul.f32 %v2695_v14, %v1995_v62  ;;  %v2144_v14 = vld [vmem:[%s3734_s6 + $0x28] sm:$0xff]  ;;  %s4346_s6 = sld [smem:[#allocation10_spill]] }
 0x4a5   : > { %3330 = vmatpush3.bf16.msra.mxu1 %v3329_v61  ;;  %v3332_v9 = vpack.c.bf16 %v2144_v14, %v2143_v3 }
 0x4a6   : > { %2022 = vadd.xlane.f32.xlu1 %v2009_v63  ;;  %3331 = vmatprep.subr.bf16.mxu1 %v3513_v24 }
 0x4a9   : > { %3333 = vmatpush3.bf16.msra.mxu1 %v3332_v9 }
 0x4aa   : > { %3334 = vmatprep.subr.bf16.mxu1 %v3513_v24  ;;  %v2123_v8 = vld [vmem:[%s4346_s6] sm:$0xff]  ;;  %v2124_v57 = vld [vmem:[%s4346_s6 + $0x8] sm:$0xff]  ;;  %v2125_v61 = vld [vmem:[%s4346_s6 + $0x10] sm:$0xff] }
 0x4ab   : > { %v2127_v14 = vld [vmem:[%s4346_s6 + $0x20] sm:$0xff]  ;;  %v2128_v9 = vld [vmem:[%s4346_s6 + $0x28] sm:$0xff]  ;;  %v2129_v2 = vld [vmem:[%s4346_s6 + $0x30] sm:$0xff] }
 0x4ac   : > { %v3356_v10 = vpack.c.bf16 %v2128_v9, %v2127_v14  ;;  %v2131_v0 = vld [vmem:[%s4346_s6 + $0x40] sm:$0xff]  ;;  %v2133_v15 = vld [vmem:[%s4346_s6 + $0x50] sm:$0xff]  ;;  %v2136_v21 = vld [vmem:[%s4346_s6 + $0x68] sm:$0xff] }
 0x4ad   : > { %3336 = vmatpush3.bf16.msra.mxu1 %v3335_v48  ;;  %v2130_v48 = vld [vmem:[%s4346_s6 + $0x38] sm:$0xff]  ;;  %v2135_v20 = vld [vmem:[%s4346_s6 + $0x60] sm:$0xff] }
 0x4ae   : > { %3337 = vmatprep.subr.bf16.mxu1 %v3513_v24  ;;  %v3359_v18 = vpack.c.bf16 %v2130_v48, %v2129_v2  ;;  %v2138_v23 = vld [vmem:[%s4346_s6 + $0x78] sm:$0xff] }
 0x4b0   : > { %2402 = vperm.xlu0 %3456, %v1079_v58  }
 0x4b1   : > { %3339 = vmatpush3.bf16.msra.mxu1 %v3338_v12  ;;  %v2132_v12 = vld [vmem:[%s4346_s6 + $0x48] sm:$0xff] }
 0x4b2   : > { %3340 = vmatprep.subr.bf16.mxu1 %v3513_v24  ;;  %v3362_v11 = vpack.c.bf16 %v2132_v12, %v2131_v0 }
 0x4b5   : > { %3342 = vmatpush3.bf16.msra.mxu1 %v3341_v17 }
 0x4b6   : > { %3343 = vmatprep.subr.bf16.mxu1 %v3513_v24 }
 0x4b9   : > { %3345 = vmatpush3.bf16.msra.mxu1 %v3344_v22  ;;  %v2137_v22 = vld [vmem:[%s4346_s6 + $0x70] sm:$0xff] }
 0x4ba   : > { %3346 = vmatprep.subr.bf16.mxu1 %v3513_v24  ;;  %v3371_v25 = vpack.c.bf16 %v2138_v23, %v2137_v22 }
 0x4bd   : > { %3348 = vmatpush3.bf16.msra.mxu1 %v3347_v28  ;;  %v2306_v28 = vld [vmem:[%s3743_s14] sm:$0xff] }
 0x4be   : > { %3373 = vmatprep.subr.bf16.mxu1 %v3513_v24 }
 0x4d3   : > { %2060 = vxpose.xlu1.c.b16.start [1/4] (short) (narrow) %v3465_v16, 16  ;;  %v2134_v16 = vld [vmem:[%s4346_s6 + $0x58] sm:$0xff] }
 0x4d4   : > { %v3365_v17 = vpack.c.bf16 %v2134_v16, %v2133_v15 }
 0x4d7   : > { %2061 = vxpose.xlu1.c.b16.cont [2/4] (short) (narrow) %v3466_v51, 16  ;;  %v3368_v51 = vpack.c.bf16 %v2136_v21, %v2135_v20 }
 0x4db   : > { %2062 = vxpose.xlu1.c.b16.cont [3/4] (short) (narrow) %v3467_v26, 16  ;;  %v4202_v26 = vld [vmem:[%s3753_s16] sm:$0xff] }
 0x4df   : > { %2063 = vxpose.xlu1.c.b16.end [4/4] (short) (narrow) %v3468_v31, 16  ;;  %v2307_v31 = vld [vmem:[%s3743_s14 + $0x8] sm:$0xff] }
 0x51b   : > { %v2011_v52 = vpop.xlane.xlu1 %2010 }
 0x51c   : > { %v2024_v29 = vmul.f32 %v2011_v52, %v3885_v32  ;;  %v3374_v52 = vpack.c.bf16 %v2307_v31, %v2306_v28 }
 0x51e   : > { %v2696_v34 = vclamps-f32 %v2024_v29, 100.0  ;;  %v2308_v29 = vld [vmem:[%s3743_s14 + $0x10] sm:$0xff] }
 0x51f   : > { %v2013_v33 = vpop.xlane.xlu1 %2012 }
 0x520   : > { %v2025_v37 = vmul.f32 %v2013_v33, %v3901_v45  ;;  %v2045_v39 = vadd.f32 %v2696_v34, %v4073_v27  ;;  %v2309_v33 = vld [vmem:[%s3743_s14 + $0x18] sm:$0xff] }
 0x522   : > { %v2697_v38 = vclamps-f32 %v2025_v37, 100.0 }
 0x523   : > { %v2015_v54 = vpop.xlane.xlu1 %2014 }
 0x524   : > { %v2046_v41 = vadd.f32 %v2697_v38, %v4078_v36  ;;  %v2026_v42 = vmul.f32 %v2015_v54, %v3882_v30  ;;  %v3377_v54 = vpack.c.bf16 %v2309_v33, %v2308_v29 }
 0x526   : > { %v2052_v43 = vpack.c.bf16 %v2046_v41, %v2045_v39  ;;  %v2698_v46 = vclamps-f32 %v2026_v42, 100.0  ;;  %v2310_v41 = vld [vmem:[%s3743_s14 + $0x20] sm:$0xff]  ;;  %v2311_v42 = vld [vmem:[%s3743_s14 + $0x28] sm:$0xff] }
 0x527   : > { %v2017_v44 = vpop.xlane.xlu0 %2016 }
 0x528   : > { %v2027_v59 = vmul.f32 %v2017_v44, %v3892_v35  ;;  %3113 = vmatpush3.bf16.msra.mxu0 %v2052_v43  ;;  %v2047_v45 = vadd.f32 %v2698_v46, %v4083_v40  ;;  %v3380_v43 = vpack.c.bf16 %v2311_v42, %v2310_v41  ;;  %v2312_v44 = vld [vmem:[%s3743_s14 + $0x30] sm:$0xff]  ;;  %v2313_v46 = vld [vmem:[%s3743_s14 + $0x38] sm:$0xff] }
 0x529   : > { %3114 = vmatprep.subr.bf16.mxu0 %v3516_v13 }
 0x52a   : > { %v2699_v32 = vclamps-f32 %v2027_v59, 100.0  ;;  %v3383_v59 = vpack.c.bf16 %v2313_v46, %v2312_v44 }
 0x52b   : > { %v2019_v55 = vpop.xlane.xlu1 %2018 }
 0x52c   : > { %v2048_v60 = vadd.f32 %v2699_v32, %v4088_v56  ;;  %v2028_v27 = vmul.f32 %v2019_v55, %v3908_v49  ;;  %v2315_v32 = vld [vmem:[%s3743_s14 + $0x48] sm:$0xff] }
 0x52e   : > { %v2053_v62 = vpack.c.bf16 %v2048_v60, %v2047_v45  ;;  %v2700_v30 = vclamps-f32 %v2028_v27, 100.0  ;;  %v2316_v45 = vld [vmem:[%s3743_s14 + $0x50] sm:$0xff]  ;;  %v2317_v60 = vld [vmem:[%s3743_s14 + $0x58] sm:$0xff] }
 0x52f   : > { %v2021_v36 = vpop.xlane.xlu1 %2020  ;;  %v3389_v27 = vpack.c.bf16 %v2317_v60, %v2316_v45 }
 0x530   : > { %v2029_v63 = vmul.f32 %v2021_v36, %v3918_v53  ;;  %3115 = vmatpush3.bf16.msra.mxu0 %v2053_v62  ;;  %v2049_v1 = vadd.f32 %v2700_v30, %v4093_v47  ;;  %v2318_v62 = vld [vmem:[%s3743_s14 + $0x60] sm:$0xff]  ;;  %v2319_v36 = vld [vmem:[%s3743_s14 + $0x68] sm:$0xff] }
 0x531   : > { %3116 = vmatprep.subr.bf16.mxu0 %v3516_v13 }
 0x532   : > { %v2701_v35 = vclamps-f32 %v2029_v63, 100.0  ;;  %v3392_v63 = vpack.c.bf16 %v2319_v36, %v2318_v62 }
 0x533   : > { %v2023_v58 = vpop.xlane.xlu1 %2022 }
 0x534   : > { %v2050_v40 = vadd.f32 %v2701_v35, %v4098_v4  ;;  %v2030_v56 = vmul.f32 %v2023_v58, %v3911_v50  ;;  %v3350_v50 = vpack.c.bf16 %v2124_v57, %v2123_v8  ;;  %v2320_v58 = vld [vmem:[%s3743_s14 + $0x70] sm:$0xff] }
 0x536   : > { %v2054_v49 = vpack.c.bf16 %v2050_v40, %v2049_v1  ;;  %v2702_v5 = vclamps-f32 %v2030_v56, 100.0  ;;  %v2321_v1 = vld [vmem:[%s3743_s14 + $0x78] sm:$0xff] }
 0x537   : > { %v3395_v40 = vpack.c.bf16 %v2321_v1, %v2320_v58 }
 0x538   : > { %v2051_v7 = vadd.f32 %v2702_v5, %v4103_v6  ;;  %3117 = vmatpush3.bf16.msra.mxu0 %v2054_v49  ;;  %v2126_v6 = vld [vmem:[%s4346_s6 + $0x18] sm:$0xff]  ;;  %v2704_v49 = vld [vmem:[%s956_s12] ss:$0 sm:$0xff] }
 0x539   : > { %3118 = vmatprep.subr.bf16.mxu0 %v3516_v13  ;;  %v2068_v4 = vpop.trf.xlu1  ;;  %v3353_v3 = vpack.c.bf16 %v2126_v6, %v2125_v61 }
 0x53a   : > { %v2055_v53 = vpack.c.bf16 %v2051_v7, %v2051_v7 }
 0x53c   : > { %v2081_v47 = vsel %vm1119_vm3, %v2055_v53, 0 }
 0x53d   : > { %3119 = vmatpush3.bf16.msra.mxu0 %v2081_v47 }
 0x53e   : > { %3349 = vmatprep.subr.bf16.mxu0 %v3513_v24 }
 0x540   : > { %3121 = vmatmul.mubr.msk.bf16.vlgmr.msra.gmra.mrb[36].mxu0 %vm2076_vm0, %v2068_v4  ;;  %v2403_v4 = vpop.permute.xlu0 %2402 }
 0x541   : > { %3351 = vmatpush3.bf16.msra.mxu0 %v3350_v50  ;;  %3191 = vmatprep.mubr.msk.f32.mxu0 %vm3515_vm5, %v3516_v13 }
 0x542   : > { %3352 = vmatprep.subr.bf16.mxu0 %v3513_v24 }
 0x545   : > { %3354 = vmatpush3.bf16.msra.mxu0 %v3353_v3 }
 0x546   : > { %3355 = vmatprep.subr.bf16.mxu0 %v3513_v24 }
 0x549   : > { %3357 = vmatpush3.bf16.msra.mxu0 %v3356_v10 }
 0x54a   : > { %3358 = vmatprep.subr.bf16.mxu0 %v3513_v24 }
 0x54d   : > { %3360 = vmatpush3.bf16.msra.mxu0 %v3359_v18 }
 0x54e   : > { %3361 = vmatprep.subr.bf16.mxu0 %v3513_v24 }
 0x551   : > { %3363 = vmatpush3.bf16.msra.mxu0 %v3362_v11 }
 0x552   : > { %3364 = vmatprep.subr.bf16.mxu0 %v3513_v24 }
 0x555   : > { %3366 = vmatpush3.bf16.msra.mxu0 %v3365_v17 }
 0x556   : > { %3367 = vmatprep.subr.bf16.mxu0 %v3513_v24 }
 0x559   : > { %3369 = vmatpush3.bf16.msra.mxu0 %v3368_v51 }
 0x55a   : > { %3370 = vmatprep.subr.bf16.mxu0 %v3513_v24 }
 0x55d   : > { %3372 = vmatpush3.bf16.msra.mxu0 %v3371_v25 }
 0x560   : > { %3192 = vmatmul.mubr.f32.vlgmr.msra.gmra.mrb[40].mxu0 %v4202_v26 }
 0x613   : > { %v2117_v34 = vpop.f32.mrb[36].mxu0 }
 0x614   : > { %3157 = vmatmul.mubr.f32.vlgmr.msra.gmra.mrb[36].mxu1 %v2117_v34  ;;  %v3122_v37 = vpop.f32.mrb[37].mxu0  ;;  %v2399_v47 = vmul.f32 %v3875_v19, %v2117_v34 }
 0x615   : > { %v2120_v38 = vpop.f32.mrb[38].mxu0  ;;  %3375 = vmatpush3.bf16.msra.mxu1 %v3374_v52  ;;  %3226 = vmatprep.mubr.msk.f32.mxu1 %vm3515_vm5, %v3516_v13  ;;  %v2314_v13 = vld [vmem:[%s3743_s14 + $0x40] sm:$0xff] }
 0x616   : > { %v3123_v39 = vpop.f32.mrb[39].mxu0  ;;  %3376 = vmatprep.subr.bf16.mxu1 %v3513_v24  ;;  %v3386_v55 = vpack.c.bf16 %v2315_v32, %v2314_v13  ;;  %v2405_v3 = vmul.f32 %v2403_v4, %v2399_v47 }
 0x619   : > { %3378 = vmatpush3.bf16.msra.mxu1 %v3377_v54 }
 0x61a   : > { %3379 = vmatprep.subr.bf16.mxu1 %v3513_v24 }
 0x61d   : > { %3381 = vmatpush3.bf16.msra.mxu1 %v3380_v43 }
 0x61e   : > { %3382 = vmatprep.subr.bf16.mxu1 %v3513_v24 }
 0x621   : > { %3384 = vmatpush3.bf16.msra.mxu1 %v3383_v59 }
 0x622   : > { %3385 = vmatprep.subr.bf16.mxu1 %v3513_v24 }
 0x625   : > { %3387 = vmatpush3.bf16.msra.mxu1 %v3386_v55 }
 0x626   : > { %3388 = vmatprep.subr.bf16.mxu1 %v3513_v24 }
 0x629   : > { %3390 = vmatpush3.bf16.msra.mxu1 %v3389_v27 }
 0x62a   : > { %3391 = vmatprep.subr.bf16.mxu1 %v3513_v24 }
 0x62d   : > { %3393 = vmatpush3.bf16.msra.mxu1 %v3392_v63 }
 0x62e   : > { %3394 = vmatprep.subr.bf16.mxu1 %v3513_v24  ;;  %v2705_v24 = vld [vmem:[%s964_s30] ss:$0 sm:$0xff] }
 0x631   : > { %3396 = vmatpush3.bf16.msra.mxu1 %v3395_v40 }
 0x633   : > { %v2291_v30 = vpop.f32.mrb[40].mxu0 }
 0x634   : > { %v3193_v35 = vpop.f32.mrb[41].mxu0 }
 0x6e7   : > { %v2221_v56 = vpop.f32.mrb[36].mxu1 }
 0x6e8   : > { %v2292_v5 = vadd.f32 %v2291_v30, %v2221_v56  ;;  %v3158_v7 = vpop.f32.mrb[37].mxu1 }
 0x6ea   : > { %v2302_v53 = vadd.f32 %v2704_v49, %v2292_v5 }
 0x6ec   : > { %v2304_v8 = vmul.f32 0.2, %v2302_v53  ;;  %vm2303_vm3 = vcmp.ge.f32.partialorder %v2302_v53, 0.0 }
 0x6ee   : > { %v2305_v57 = vsel %vm2303_vm3, %v2302_v53, %v2304_v8 }
 0x6ef   : > { %3227 = vmatmul.mubr.f32.vlgmr.msra.gmra.mrb[38].mxu1 %v2305_v57 }
 0x7c2   : > { %v2395_v50 = vpop.f32.mrb[38].mxu1 }
 0x7c3   : > { %v2396_v61 = vadd.f32 %v2705_v24, %v2395_v50  ;;  %v3228_v6 = vpop.f32.mrb[39].mxu1 }
 0x7c5   : > { %v2406_v14 = vadd.f32 %v4202_v26, %v2396_v61 }
 0x7c7   : > { %v2407_v9 = vadd.f32 %v2406_v14, %v2405_v3 }
 0x7c9   : > { %2408 = vst [vmem:[%s3753_s16] sm:$0xff] %v2407_v9 }
 0x7ca PF: > { %s4348_s12 = sld [smem:[#allocation5_spill]]  ;;  %s4349_s3 = sld [smem:[#allocation3_spill]] }
 0x7cb   : > { %s4350_s28 = sld [smem:[#allocation4_spill]]  ;;  %s4351_s29 = sld [smem:[#allocation6_spill]] }
 0x7cc   : > { %s4352_s30 = sld [smem:[#allocation7_spill]] }
 0x7d0   : > { %s32_s4 = sadd.s32 1, %s4348_s12  }
 0x7d1   : > { %p29_p8 = scmp.ge.s32.totalorder %s32_s4, 10  }
 0x7d3   :  { %31 = sbr.rel (!%p29_p8) target bundleno = 19 (0x13), region = 190 }

</bundles_post_ra>
